<compile_context>
chip_gen: v7x
topology: tpu7x:2x2x1
jax: 0.10.0
libtpu: 0.0.40
codegen_flags: <defaults>
</compile_context>

<pallas_src>
import math

import jax
import jax.numpy as jnp
from jax import lax
from jax.experimental import pallas as pl
from jax.experimental.pallas import tpu as pltpu


def _round_up(x, m):
    return ((x + m - 1) // m) * m


def _vmem_limit_bytes():
    """Generation-aware VMEM limit (leave headroom below physical capacity)."""
    try:
        cap = pltpu.get_tpu_info().vmem_capacity_bytes
    except Exception:
        cap = 64 * 1024 * 1024                       # conservative (v7x: 64 MiB)
    return max(32 * 1024 * 1024, min(cap - 16 * 1024 * 1024, 112 * 1024 * 1024))


def _choose_row_tile(B, H, W, cin_p, chid_p, cout_p, vmem_limit):
    """Largest divisor of H whose per-step live set fits the VMEM budget.

    Counts ALL residents (resident per-batch x, buffered weights, output
    blocks, the h scratch and in-kernel temporaries), and keeps >= 2 grid
    steps when B == 1 so both v7x TensorCores get work.
    """
    N = H * W
    nbuf = 2      # budget as if double-buffered, even if single-buffering kicks in
    fixed = nbuf * (N * cin_p * 2                                 # per-batch x (bf16)
                    + cin_p * chid_p * 2 + chid_p * cout_p * 2    # fc1 / fc2 weights
                    + (11 * chid_p + cout_p) * 4)                 # biases + dw weights
    budget = int(0.7 * (vmem_limit - fixed))
    best = 1
    max_th = H if B >= 2 else max(H // 2, 1)         # keep >= 2 steps when B == 1
    for th in range(1, max_th + 1):
        if H % th:
            continue
        s, thw = (th + 2) * W, th * W
        live = (s * cin_p * 2                        # xs slab (bf16)
                + 4 * s * chid_p * 4                 # h scratch + h/h_l/h_r (f32)
                + thw * chid_p * 6                   # conv acc (f32) + bf16 cast of g
                + (1 + nbuf) * thw * cout_p * 4)     # fc2 result + output buffers
        if live <= budget:
            best = th
    return best


def _make_mlp_kernel(H, W, TH, approx_gelu=True):
    """Pallas kernel closed over static spatial dims and the row-tile size."""
    S = (TH + 2) * W          # flattened slab rows (tile + 1-row halo each side)
    THW = TH * W              # flattened output rows of this tile
    inv_sqrt2 = 1.0 / math.sqrt(2.0)

    def mlp_kernel(x_ref, w1_ref, b1_ref, dww_ref, dwb_ref, w2_ref, b2_ref,
                   o_ref, h_scr):
        chid = h_scr.shape[1]
        t = pl.program_id(1)
        r0 = t * TH                                    # first output image row

        # ---- gather x rows r0-1 .. r0+TH (clamped halo reads; fixed below) ----
        top = jnp.maximum(r0 - 1, 0)
        bot = jnp.minimum(r0 + TH, H - 1)
        x_top = x_ref[0, pl.ds(pl.multiple_of(top * W, W), W), :]
        x_mid = x_ref[0, pl.ds(pl.multiple_of(r0 * W, THW), THW), :]
        x_bot = x_ref[0, pl.ds(pl.multiple_of(bot * W, W), W), :]
        xs = jnp.concatenate([x_top, x_mid, x_bot], axis=0)       # (S, Cin_p) bf16

        # ---- fc1 (bf16 MXU, f32 accumulate) + bias + ReLU into VMEM scratch ----
        h_scr[...] = jnp.maximum(
            jnp.dot(xs, w1_ref[...], preferred_element_type=jnp.float32)
            + b1_ref[...], 0.0)

        # Zero the halo rows that fall outside the image (== the conv's zero
        # padding).  pl.when-gated: interior tiles skip this entirely.
        @pl.when(t == 0)
        def _():
            h_scr[0:W, :] = jnp.zeros((W, chid), jnp.float32)

        @pl.when(t == pl.num_programs(1) - 1)
        def _():
            h_scr[S - W:S, :] = jnp.zeros((W, chid), jnp.float32)

        h = h_scr[...]                                             # (S, chid) f32

        # ---- depthwise 3x3 conv: horizontal neighbours via XLU roll + masks ----
        # NOTE: roll is cyclic; the wrapped rows (slab row 0 for h_l, slab row
        # S-1 for h_r) land exactly on the masked columns (col==0 / col==W-1),
        # so the masks keep the result exact.  pltpu.roll requires non-negative
        # shifts, so "-1" is expressed as S-1.
        col = lax.broadcasted_iota(jnp.int32, (S, 1), 0) % W
        h_l = jnp.where(col >= 1, pltpu.roll(h, shift=1, axis=0), 0.0)      # h[y, x-1]
        h_r = jnp.where(col <= W - 2, pltpu.roll(h, shift=S - 1, axis=0), 0.0)  # h[y, x+1]

        dww = dww_ref[...]                                         # (9, chid)
        acc = jnp.broadcast_to(dwb_ref[...], (THW, chid))   # init from dw bias
        for ky in range(3):
            off = ky * W                                     # vertical tap = row offset
            acc = acc + h_l[off:off + THW] * dww[ky * 3 + 0:ky * 3 + 1, :]
            acc = acc + h[off:off + THW] * dww[ky * 3 + 1:ky * 3 + 2, :]
            acc = acc + h_r[off:off + THW] * dww[ky * 3 + 2:ky * 3 + 3, :]

        # ---- GELU: tanh approximation keeps the transcendental on the EUP and
        # cuts ~20 VALU ops/element vs the exact-erf polynomial ----
        if approx_gelu:
            inner = acc + 0.044715 * (acc * acc * acc)
            g = 0.5 * acc * (1.0 + jnp.tanh(0.7978845608028654 * inner))
        else:
            g = 0.5 * acc * (1.0 + lax.erf(acc * inv_sqrt2))

        # ---- fc2 (bf16 MXU, f32 accumulate) + bias; dropout(p=0) is identity ----
        out = jnp.dot(g.astype(jnp.bfloat16), w2_ref[...],
                      preferred_element_type=jnp.float32)
        o_ref[0] = (out + b2_ref[...]).astype(o_ref.dtype)

    return mlp_kernel


def mlp_pallas(x, params, H, W, row_tile=None, approx_gelu=True):
    """x: (B, N, Cin) with N = H*W (row-major, N = y*W + x). Returns (B, N, Cout)."""
    B, N, Cin = x.shape
    Chid = params["w1"].shape[1]
    Cout = params["w2"].shape[1]
    assert N == H * W
    # W % 8 == 0 keeps all sublane slices / tap offsets aligned (no relayouts);
    # other widths are still correct, just slower.

    # Pad every channel dim to a multiple of 128: fills the MXU and makes the
    # output store lane-dense. Zero padding is exact (padded lanes stay zero).
    Cin_p, Chid_p, Cout_p = (_round_up(c, 128) for c in (Cin, Chid, Cout))

    # bf16 MXU operands (f32 accumulation happens inside the kernel).
    xp = jnp.pad(x, ((0, 0), (0, 0), (0, Cin_p - Cin))).astype(jnp.bfloat16)
    w1p = jnp.pad(params["w1"], ((0, Cin_p - Cin), (0, Chid_p - Chid))).astype(jnp.bfloat16)
    b1p = jnp.pad(params["b1"], ((0, 0), (0, Chid_p - Chid)))
    dwwp = jnp.pad(params["dw_w"], ((0, 0), (0, Chid_p - Chid)))
    dwbp = jnp.pad(params["dw_b"], ((0, 0), (0, Chid_p - Chid)))
    w2p = jnp.pad(params["w2"], ((0, Chid_p - Chid), (0, Cout_p - Cout))).astype(jnp.bfloat16)
    b2p = jnp.pad(params["b2"], ((0, 0), (0, Cout_p - Cout)))

    vmem_limit = _vmem_limit_bytes()
    if row_tile is None:
        row_tile = _choose_row_tile(B, H, W, Cin_p, Chid_p, Cout_p, vmem_limit)
    TH = row_tile
    assert H % TH == 0, "row_tile must divide H"
    nT = H // TH
    S = (TH + 2) * W

    kernel = _make_mlp_kernel(H, W, TH, approx_gelu)

    cost = pl.CostEstimate(
        flops=2 * B * N * (Cin_p * Chid_p + Chid_p * Cout_p) + 18 * B * N * Chid_p,
        transcendentals=B * N * Chid_p,
        bytes_accessed=B * N * (Cin_p * 2 + Cout_p * 4)
        + (Cin_p * Chid_p + Chid_p * Cout_p) * 2,
    )

    def run(single_buffer):
        def in_spec(shape, imap):
            if single_buffer:
                # Grid-invariant blocks don't need double buffering -> reclaim VMEM.
                return pl.BlockSpec(shape, imap, pipeline_mode=pl.Buffered(1))
            return pl.BlockSpec(shape, imap)

        grid_spec = pltpu.PrefetchScalarGridSpec(
            num_scalar_prefetch=0,
            grid=(B, nT),
            in_specs=[
                # x: full per-batch image, resident across the row-tile axis
                in_spec((1, N, Cin_p), lambda b, t: (b, 0, 0)),
                in_spec((Cin_p, Chid_p), lambda b, t: (0, 0)),   # fc1 weight
                in_spec((1, Chid_p), lambda b, t: (0, 0)),       # fc1 bias
                in_spec((9, Chid_p), lambda b, t: (0, 0)),       # dw weights (tap, ch)
                in_spec((1, Chid_p), lambda b, t: (0, 0)),       # dw bias
                in_spec((Chid_p, Cout_p), lambda b, t: (0, 0)),  # fc2 weight
                in_spec((1, Cout_p), lambda b, t: (0, 0)),       # fc2 bias
            ],
            out_specs=pl.BlockSpec((1, TH * W, Cout_p), lambda b, t: (b, t, 0)),
            scratch_shapes=[pltpu.VMEM((S, Chid_p), jnp.float32)],   # hidden slab
        )
        return pl.pallas_call(
            kernel,
            out_shape=jax.ShapeDtypeStruct((B, N, Cout_p), x.dtype),
            grid_spec=grid_spec,
            compiler_params=pltpu.CompilerParams(
                dimension_semantics=("parallel", "parallel"),
                vmem_limit_bytes=vmem_limit),
            cost_estimate=cost,
        )(xp, w1p, b1p, dwwp, dwbp, w2p, b2p)

    try:
        out_p = run(single_buffer=True)
    except Exception:
        # pl.Buffered(1) single-buffering is a newer feature; fall back to the
        # default double-buffered pipeline if this jax/Mosaic build rejects it.
        out_p = run(single_buffer=False)

    return out_p[..., :Cout] if Cout_p != Cout else out_p


def init_params(key, in_features, hidden_features, out_features):
    """Deterministic synthetic init mirroring Mlp._init_weights shapes."""
    k1, k2, k3 = jax.random.split(key, 3)
    w1 = (0.02 * jax.random.truncated_normal(
        k1, -2.0, 2.0, (in_features, hidden_features))).astype(jnp.float32)
    b1 = jnp.zeros((1, hidden_features), jnp.float32)
    dw_std = math.sqrt(2.0 / 9.0)
    dw_torch = (dw_std * jax.random.normal(k2, (hidden_features, 1, 3, 3))).astype(jnp.float32)
    dw_w = jnp.transpose(dw_torch[:, 0, :, :], (1, 2, 0)).reshape(9, hidden_features)
    dw_b = jnp.zeros((1, hidden_features), jnp.float32)
    w2 = (0.02 * jax.random.truncated_normal(
        k3, -2.0, 2.0, (hidden_features, out_features))).astype(jnp.float32)
    b2 = jnp.zeros((1, out_features), jnp.float32)
    return {"w1": w1, "b1": b1, "dw_w": dw_w, "dw_b": dw_b, "w2": w2, "b2": b2,
            "dw_torch": dw_torch}


def mlp_reference(x, params, H, W, matmul_dtype=jnp.float32, approx_gelu=False):
    """Plain-JAX reference reproducing the PyTorch forward (optionally with the
    same bf16 matmul inputs / tanh GELU used by the kernel)."""
    B, N, Cin = x.shape
    Chid = params["w1"].shape[1]
    h = jnp.dot(x.astype(matmul_dtype), params["w1"].astype(matmul_dtype),
                preferred_element_type=jnp.float32) + params["b1"]
    h = jnp.maximum(h, 0.0)
    img = h.reshape(B, H, W, Chid)                               # NHWC
    w_hwio = jnp.transpose(params["dw_torch"], (2, 3, 1, 0))     # (3,3,1,Chid)
    conv = lax.conv_general_dilated(
        img, w_hwio, window_strides=(1, 1), padding="SAME",
        dimension_numbers=("NHWC", "HWIO", "NHWC"),
        feature_group_count=Chid)
    conv = (conv + params["dw_b"][0]).reshape(B, N, Chid)
    if approx_gelu:
        inner = conv + 0.044715 * (conv * conv * conv)
        g = 0.5 * conv * (1.0 + jnp.tanh(0.7978845608028654 * inner))
    else:
        g = 0.5 * conv * (1.0 + lax.erf(conv / math.sqrt(2.0)))  # exact GELU
    return jnp.dot(g.astype(matmul_dtype), params["w2"].astype(matmul_dtype),
                   preferred_element_type=jnp.float32) + params["b2"]


if __name__ == "__main__":
    B, H, W = 2, 8, 8
    N = H * W
    in_features, hidden_features, out_features = 32, 64, 32

    key = jax.random.PRNGKey(0)
    kx_, kp = jax.random.split(key)
    x = jax.random.normal(kx_, (B, N, in_features), dtype=jnp.float32)
    params = init_params(kp, in_features, hidden_features, out_features)

    # row_tile=4 -> 2 spatial tiles per image, exercising the halo / pl.when path.
    out = mlp_pallas(x, params, H, W, row_tile=4)
    out = jax.block_until_ready(out)
    assert out.shape == (B, N, out_features)

    # Tight check vs a reference that mirrors the kernel (bf16 MXU inputs,
    # tanh-approx GELU).
    ref_match = mlp_reference(x, params, H, W, matmul_dtype=jnp.bfloat16,
                              approx_gelu=True)
    assert jnp.allclose(out, ref_match, atol=2e-3, rtol=2e-3), \
        "mismatch vs matched (bf16 + tanh-GELU) reference"

    # Looser sanity check vs the exact-erf f32 reference (torch semantics);
    # slack covers the bf16 MXU inputs and the tanh GELU approximation.
    ref_f32 = mlp_reference(x, params, H, W)
    assert jnp.allclose(out, ref_f32, atol=2e-2, rtol=2e-2), \
        "mismatch vs exact f32 reference"

    print("KERNEL_OK")
</pallas_src>

<mosaic_0001>
module attributes {stable_mosaic.version = 11 : i64} {
  func.func @mlp_kernel(%arg0: i32, %arg1: i32, %arg2: memref<1x64x128xbf16, #tpu.memory_space<vmem>>, %arg3: memref<128x128xbf16, #tpu.memory_space<vmem>>, %arg4: memref<1x128xf32, #tpu.memory_space<vmem>>, %arg5: memref<9x128xf32, #tpu.memory_space<vmem>>, %arg6: memref<1x128xf32, #tpu.memory_space<vmem>>, %arg7: memref<128x128xbf16, #tpu.memory_space<vmem>>, %arg8: memref<1x128xf32, #tpu.memory_space<vmem>>, %arg9: memref<1x32x128xf32, #tpu.memory_space<vmem>>, %arg10: memref<48x128xf32, #tpu.memory_space<vmem>>) attributes {dimension_semantics = [#tpu.dimension_semantics<parallel>, #tpu.dimension_semantics<parallel>], iteration_bounds = array<i64: 2, 2>, scalar_prefetch = 0 : i64, scratch_operands = 1 : i64, tpu.core_type = #tpu.core_type<tc>, window_params = [{pipeline_mode = #tpu.pipeline_mode<synchronous>, transform_indices = @transform_0, window_bounds = array<i64: 1, 64, 128>}, {pipeline_mode = #tpu.pipeline_mode<synchronous>, transform_indices = @transform_1, window_bounds = array<i64: 128, 128>}, {pipeline_mode = #tpu.pipeline_mode<synchronous>, transform_indices = @transform_2, window_bounds = array<i64: 1, 128>}, {pipeline_mode = #tpu.pipeline_mode<synchronous>, transform_indices = @transform_3, window_bounds = array<i64: 9, 128>}, {pipeline_mode = #tpu.pipeline_mode<synchronous>, transform_indices = @transform_4, window_bounds = array<i64: 1, 128>}, {pipeline_mode = #tpu.pipeline_mode<synchronous>, transform_indices = @transform_5, window_bounds = array<i64: 128, 128>}, {pipeline_mode = #tpu.pipeline_mode<synchronous>, transform_indices = @transform_6, window_bounds = array<i64: 1, 128>}, {transform_indices = @transform_7, window_bounds = array<i64: 1, 32, 128>}]} {
    %c4_i32 = arith.constant 4 : i32
    %0 = arith.muli %arg1, %c4_i32 : i32
    %c1_i32 = arith.constant 1 : i32
    %1 = arith.subi %0, %c1_i32 : i32
    %c0_i32 = arith.constant 0 : i32
    %2 = arith.maxsi %1, %c0_i32 : i32
    %c4_i32_0 = arith.constant 4 : i32
    %3 = arith.addi %0, %c4_i32_0 : i32
    %c7_i32 = arith.constant 7 : i32
    %4 = arith.minsi %3, %c7_i32 : i32
    %c8_i32 = arith.constant 8 : i32
    %5 = arith.muli %2, %c8_i32 : i32
    %6 = tpu.assume_multiple %5, 8 : i32
    %c0 = arith.constant 0 : index
    %7 = arith.index_cast %6 : i32 to index
    %c0_1 = arith.constant 0 : index
    %8 = vector.load %arg2[%c0, %7, %c0_1] : memref<1x64x128xbf16, #tpu.memory_space<vmem>>, vector<1x8x128xbf16>
    %9 = vector.shape_cast %8 : vector<1x8x128xbf16> to vector<8x128xbf16>
    %c8_i32_2 = arith.constant 8 : i32
    %10 = arith.muli %0, %c8_i32_2 : i32
    %11 = tpu.assume_multiple %10, 32 : i32
    %c0_3 = arith.constant 0 : index
    %12 = arith.index_cast %11 : i32 to index
    %c0_4 = arith.constant 0 : index
    %13 = vector.load %arg2[%c0_3, %12, %c0_4] : memref<1x64x128xbf16, #tpu.memory_space<vmem>>, vector<1x32x128xbf16>
    %14 = vector.shape_cast %13 : vector<1x32x128xbf16> to vector<32x128xbf16>
    %c8_i32_5 = arith.constant 8 : i32
    %15 = arith.muli %4, %c8_i32_5 : i32
    %16 = tpu.assume_multiple %15, 8 : i32
    %c0_6 = arith.constant 0 : index
    %17 = arith.index_cast %16 : i32 to index
    %c0_7 = arith.constant 0 : index
    %18 = vector.load %arg2[%c0_6, %17, %c0_7] : memref<1x64x128xbf16, #tpu.memory_space<vmem>>, vector<1x8x128xbf16>
    %19 = vector.shape_cast %18 : vector<1x8x128xbf16> to vector<8x128xbf16>
    %20 = tpu.concatenate %9, %14, %19 in 0 : vector<8x128xbf16>, vector<32x128xbf16>, vector<8x128xbf16> -> vector<48x128xbf16>
    %c0_8 = arith.constant 0 : index
    %c0_9 = arith.constant 0 : index
    %21 = vector.load %arg3[%c0_8, %c0_9] : memref<128x128xbf16, #tpu.memory_space<vmem>>, vector<128x128xbf16>
    %cst = arith.constant dense<0.000000e+00> : vector<48x128xf32>
    %22 = tpu.matmul %20, %21, %cst {dimension_numbers = #tpu.dot_dimension_numbers<[1], [0], [0], [1], [0, 0, 1, 1], [], []>} : vector<48x128xbf16>, vector<128x128xbf16>, vector<48x128xf32> -> vector<48x128xf32>
    %c0_10 = arith.constant 0 : index
    %c0_11 = arith.constant 0 : index
    %23 = vector.load %arg4[%c0_10, %c0_11] : memref<1x128xf32, #tpu.memory_space<vmem>>, vector<1x128xf32>
    %24 = vector.broadcast %23 : vector<1x128xf32> to vector<48x128xf32>
    %25 = arith.addf %22, %24 : vector<48x128xf32>
    %cst_12 = arith.constant 0.000000e+00 : f32
    %26 = vector.broadcast %cst_12 : f32 to vector<48x128xf32>
    %27 = arith.maximumf %25, %26 : vector<48x128xf32>
    %c0_13 = arith.constant 0 : index
    %c0_14 = arith.constant 0 : index
    %28 = vector.load %arg10[%c0_13, %c0_14] : memref<48x128xf32, #tpu.memory_space<vmem>>, vector<48x128xf32>
    tpu.vector_store %arg10[%c0_13, %c0_14], %27 {strides = array<i32>} : memref<48x128xf32, #tpu.memory_space<vmem>>, vector<48x128xf32>,
    %c0_i32_15 = arith.constant 0 : i32
    %29 = arith.cmpi eq, %arg1, %c0_i32_15 : i32
    %30 = arith.extui %29 : i1 to i32
    %c0_i32_16 = arith.constant 0 : i32
    %31 = arith.cmpi ne, %30, %c0_i32_16 : i32
    scf.if %31 {
      %cst_47 = arith.constant 0.000000e+00 : f32
      %138 = vector.broadcast %cst_47 : f32 to vector<8x128xf32>
      %c0_48 = arith.constant 0 : index
      %c0_49 = arith.constant 0 : index
      %139 = vector.load %arg10[%c0_48, %c0_49] : memref<48x128xf32, #tpu.memory_space<vmem>>, vector<8x128xf32>
      tpu.vector_store %arg10[%c0_48, %c0_49], %138 {strides = array<i32>} : memref<48x128xf32, #tpu.memory_space<vmem>>, vector<8x128xf32>,
    } else {
    }
    %c1_i32_17 = arith.constant 1 : i32
    %32 = arith.cmpi eq, %arg1, %c1_i32_17 : i32
    %33 = arith.extui %32 : i1 to i32
    %c0_i32_18 = arith.constant 0 : i32
    %34 = arith.cmpi ne, %33, %c0_i32_18 : i32
    scf.if %34 {
      %cst_47 = arith.constant 0.000000e+00 : f32
      %138 = vector.broadcast %cst_47 : f32 to vector<8x128xf32>
      %c40 = arith.constant 40 : index
      %c0_48 = arith.constant 0 : index
      %139 = vector.load %arg10[%c40, %c0_48] : memref<48x128xf32, #tpu.memory_space<vmem>>, vector<8x128xf32>
      tpu.vector_store %arg10[%c40, %c0_48], %138 {strides = array<i32>} : memref<48x128xf32, #tpu.memory_space<vmem>>, vector<8x128xf32>,
    } else {
    }
    %c0_19 = arith.constant 0 : index
    %c0_20 = arith.constant 0 : index
    %35 = vector.load %arg10[%c0_19, %c0_20] : memref<48x128xf32, #tpu.memory_space<vmem>>, vector<48x128xf32>
    %36 = tpu.iota {dimensions = array<i32: 0>} : vector<48x1xi32>
    %c8_i32_21 = arith.constant 8 : i32
    %c0_i32_22 = arith.constant 0 : i32
    %37 = arith.cmpi eq, %c8_i32_21, %c0_i32_22 : i32
    %c1_i32_23 = arith.constant 1 : i32
    %38 = arith.select %37, %c1_i32_23, %c8_i32_21 : i32
    %39 = vector.broadcast %38 : i32 to vector<48x1xi32>
    %40 = arith.remsi %36, %39 : vector<48x1xi32>
    %c0_i32_24 = arith.constant 0 : i32
    %41 = vector.broadcast %c0_i32_24 : i32 to vector<48x1xi32>
    %42 = arith.cmpi ne, %40, %41 : vector<48x1xi32>
    %c0_i32_25 = arith.constant 0 : i32
    %43 = vector.broadcast %c0_i32_25 : i32 to vector<48x1xi32>
    %44 = arith.cmpi slt, %40, %43 : vector<48x1xi32>
    %c0_i32_26 = arith.constant 0 : i32
    %45 = arith.cmpi slt, %38, %c0_i32_26 : i32
    %46 = vector.broadcast %45 : i1 to vector<48x1xi1>
    %47 = vector.broadcast %46 : vector<48x1xi1> to vector<48x1xi1>
    %48 = arith.xori %44, %47 : vector<48x1xi1>
    %49 = arith.andi %48, %42 : vector<48x1xi1>
    %50 = vector.broadcast %38 : i32 to vector<48x1xi32>
    %51 = arith.addi %40, %50 : vector<48x1xi32>
    %52 = arith.select %49, %51, %40 : vector<48x1xi1>, vector<48x1xi32>
    %c1_i32_27 = arith.constant 1 : i32
    %53 = vector.broadcast %c1_i32_27 : i32 to vector<48x1xi32>
    %54 = arith.cmpi sge, %52, %53 : vector<48x1xi32>
    %c1_i32_28 = arith.constant 1 : i32
    %55 = tpu.dynamic_rotate %35 by %c1_i32_28 dim 0 : vector<48x128xf32>, i32 -> vector<48x128xf32>
    %cst_29 = arith.constant 0.000000e+00 : f32
    %56 = vector.shape_cast %54 : vector<48x1xi1> to vector<48x1xi1>
    %57 = vector.broadcast %56 : vector<48x1xi1> to vector<48x128xi1>
    %58 = vector.broadcast %cst_29 : f32 to vector<48x128xf32>
    %59 = arith.select %57, %55, %58 : vector<48x128xi1>, vector<48x128xf32>
    %c6_i32 = arith.constant 6 : i32
    %60 = vector.broadcast %c6_i32 : i32 to vector<48x1xi32>
    %61 = arith.cmpi sle, %52, %60 : vector<48x1xi32>
    %c47_i32 = arith.constant 47 : i32
    %62 = tpu.dynamic_rotate %35 by %c47_i32 dim 0 : vector<48x128xf32>, i32 -> vector<48x128xf32>
    %cst_30 = arith.constant 0.000000e+00 : f32
    %63 = vector.shape_cast %61 : vector<48x1xi1> to vector<48x1xi1>
    %64 = vector.broadcast %63 : vector<48x1xi1> to vector<48x128xi1>
    %65 = vector.broadcast %cst_30 : f32 to vector<48x128xf32>
    %66 = arith.select %64, %62, %65 : vector<48x128xi1>, vector<48x128xf32>
    %c0_31 = arith.constant 0 : index
    %c0_32 = arith.constant 0 : index
    %67 = vector.load %arg5[%c0_31, %c0_32] : memref<9x128xf32, #tpu.memory_space<vmem>>, vector<9x128xf32>
    %c0_33 = arith.constant 0 : index
    %c0_34 = arith.constant 0 : index
    %68 = vector.load %arg6[%c0_33, %c0_34] : memref<1x128xf32, #tpu.memory_space<vmem>>, vector<1x128xf32>
    %69 = vector.shape_cast %68 : vector<1x128xf32> to vector<1x128xf32>
    %70 = vector.broadcast %69 : vector<1x128xf32> to vector<32x128xf32>
    %71 = vector.extract_strided_slice %59 {offsets = [0, 0], sizes = [32, 128], strides = [1, 1]} : vector<48x128xf32> to vector<32x128xf32>
    %72 = vector.extract_strided_slice %67 {offsets = [0, 0], sizes = [1, 128], strides = [1, 1]} : vector<9x128xf32> to vector<1x128xf32>
    %73 = vector.broadcast %72 : vector<1x128xf32> to vector<32x128xf32>
    %74 = arith.mulf %71, %73 : vector<32x128xf32>
    %75 = arith.addf %70, %74 : vector<32x128xf32>
    %76 = vector.extract_strided_slice %35 {offsets = [0, 0], sizes = [32, 128], strides = [1, 1]} : vector<48x128xf32> to vector<32x128xf32>
    %77 = vector.extract_strided_slice %67 {offsets = [1, 0], sizes = [1, 128], strides = [1, 1]} : vector<9x128xf32> to vector<1x128xf32>
    %78 = vector.broadcast %77 : vector<1x128xf32> to vector<32x128xf32>
    %79 = arith.mulf %76, %78 : vector<32x128xf32>
    %80 = arith.addf %75, %79 : vector<32x128xf32>
    %81 = vector.extract_strided_slice %66 {offsets = [0, 0], sizes = [32, 128], strides = [1, 1]} : vector<48x128xf32> to vector<32x128xf32>
    %82 = vector.extract_strided_slice %67 {offsets = [2, 0], sizes = [1, 128], strides = [1, 1]} : vector<9x128xf32> to vector<1x128xf32>
    %83 = vector.broadcast %82 : vector<1x128xf32> to vector<32x128xf32>
    %84 = arith.mulf %81, %83 : vector<32x128xf32>
    %85 = arith.addf %80, %84 : vector<32x128xf32>
    %86 = vector.extract_strided_slice %59 {offsets = [8, 0], sizes = [32, 128], strides = [1, 1]} : vector<48x128xf32> to vector<32x128xf32>
    %87 = vector.extract_strided_slice %67 {offsets = [3, 0], sizes = [1, 128], strides = [1, 1]} : vector<9x128xf32> to vector<1x128xf32>
    %88 = vector.broadcast %87 : vector<1x128xf32> to vector<32x128xf32>
    %89 = arith.mulf %86, %88 : vector<32x128xf32>
    %90 = arith.addf %85, %89 : vector<32x128xf32>
    %91 = vector.extract_strided_slice %35 {offsets = [8, 0], sizes = [32, 128], strides = [1, 1]} : vector<48x128xf32> to vector<32x128xf32>
    %92 = vector.extract_strided_slice %67 {offsets = [4, 0], sizes = [1, 128], strides = [1, 1]} : vector<9x128xf32> to vector<1x128xf32>
    %93 = vector.broadcast %92 : vector<1x128xf32> to vector<32x128xf32>
    %94 = arith.mulf %91, %93 : vector<32x128xf32>
    %95 = arith.addf %90, %94 : vector<32x128xf32>
    %96 = vector.extract_strided_slice %66 {offsets = [8, 0], sizes = [32, 128], strides = [1, 1]} : vector<48x128xf32> to vector<32x128xf32>
    %97 = vector.extract_strided_slice %67 {offsets = [5, 0], sizes = [1, 128], strides = [1, 1]} : vector<9x128xf32> to vector<1x128xf32>
    %98 = vector.broadcast %97 : vector<1x128xf32> to vector<32x128xf32>
    %99 = arith.mulf %96, %98 : vector<32x128xf32>
    %100 = arith.addf %95, %99 : vector<32x128xf32>
    %101 = vector.extract_strided_slice %59 {offsets = [16, 0], sizes = [32, 128], strides = [1, 1]} : vector<48x128xf32> to vector<32x128xf32>
    %102 = vector.extract_strided_slice %67 {offsets = [6, 0], sizes = [1, 128], strides = [1, 1]} : vector<9x128xf32> to vector<1x128xf32>
    %103 = vector.broadcast %102 : vector<1x128xf32> to vector<32x128xf32>
    %104 = arith.mulf %101, %103 : vector<32x128xf32>
    %105 = arith.addf %100, %104 : vector<32x128xf32>
    %106 = vector.extract_strided_slice %35 {offsets = [16, 0], sizes = [32, 128], strides = [1, 1]} : vector<48x128xf32> to vector<32x128xf32>
    %107 = vector.extract_strided_slice %67 {offsets = [7, 0], sizes = [1, 128], strides = [1, 1]} : vector<9x128xf32> to vector<1x128xf32>
    %108 = vector.broadcast %107 : vector<1x128xf32> to vector<32x128xf32>
    %109 = arith.mulf %106, %108 : vector<32x128xf32>
    %110 = arith.addf %105, %109 : vector<32x128xf32>
    %111 = vector.extract_strided_slice %66 {offsets = [16, 0], sizes = [32, 128], strides = [1, 1]} : vector<48x128xf32> to vector<32x128xf32>
    %112 = vector.extract_strided_slice %67 {offsets = [8, 0], sizes = [1, 128], strides = [1, 1]} : vector<9x128xf32> to vector<1x128xf32>
    %113 = vector.broadcast %112 : vector<1x128xf32> to vector<32x128xf32>
    %114 = arith.mulf %111, %113 : vector<32x128xf32>
    %115 = arith.addf %110, %114 : vector<32x128xf32>
    %116 = arith.mulf %115, %115 : vector<32x128xf32>
    %117 = arith.mulf %116, %115 : vector<32x128xf32>
    %cst_35 = arith.constant 4.471500e-02 : f32
    %118 = vector.broadcast %cst_35 : f32 to vector<32x128xf32>
    %119 = arith.mulf %118, %117 : vector<32x128xf32>
    %120 = arith.addf %115, %119 : vector<32x128xf32>
    %cst_36 = arith.constant 5.000000e-01 : f32
    %121 = vector.broadcast %cst_36 : f32 to vector<32x128xf32>
    %122 = arith.mulf %121, %115 : vector<32x128xf32>
    %cst_37 = arith.constant 0.797884583 : f32
    %123 = vector.broadcast %cst_37 : f32 to vector<32x128xf32>
    %124 = arith.mulf %123, %120 : vector<32x128xf32>
    %125 = math.tanh %124 : vector<32x128xf32>
    %cst_38 = arith.constant 1.000000e+00 : f32
    %126 = vector.broadcast %cst_38 : f32 to vector<32x128xf32>
    %127 = arith.addf %126, %125 : vector<32x128xf32>
    %128 = arith.mulf %122, %127 : vector<32x128xf32>
    %129 = arith.truncf %128 : vector<32x128xf32> to vector<32x128xbf16>
    %c0_39 = arith.constant 0 : index
    %c0_40 = arith.constant 0 : index
    %130 = vector.load %arg7[%c0_39, %c0_40] : memref<128x128xbf16, #tpu.memory_space<vmem>>, vector<128x128xbf16>
    %cst_41 = arith.constant dense<0.000000e+00> : vector<32x128xf32>
    %131 = tpu.matmul %129, %130, %cst_41 {dimension_numbers = #tpu.dot_dimension_numbers<[1], [0], [0], [1], [0, 0, 1, 1], [], []>} : vector<32x128xbf16>, vector<128x128xbf16>, vector<32x128xf32> -> vector<32x128xf32>
    %c0_42 = arith.constant 0 : index
    %c0_43 = arith.constant 0 : index
    %132 = vector.load %arg8[%c0_42, %c0_43] : memref<1x128xf32, #tpu.memory_space<vmem>>, vector<1x128xf32>
    %133 = vector.broadcast %132 : vector<1x128xf32> to vector<32x128xf32>
    %134 = arith.addf %131, %133 : vector<32x128xf32>
    %c0_44 = arith.constant 0 : index
    %c0_45 = arith.constant 0 : index
    %c0_46 = arith.constant 0 : index
    %135 = vector.load %arg9[%c0_44, %c0_45, %c0_46] : memref<1x32x128xf32, #tpu.memory_space<vmem>>, vector<1x32x128xf32>
    %136 = vector.shape_cast %135 : vector<1x32x128xf32> to vector<32x128xf32>
    %137 = vector.shape_cast %134 : vector<32x128xf32> to vector<1x32x128xf32>
    tpu.vector_store %arg9[%c0_44, %c0_45, %c0_46], %137 {strides = array<i32>} : memref<1x32x128xf32, #tpu.memory_space<vmem>>, vector<1x32x128xf32>,
    return
  }
  func.func @transform_0(%arg0: i32, %arg1: i32) -> (i32, i32, i32) {
    %c0_i32 = arith.constant 0 : i32
    %c0_i32_0 = arith.constant 0 : i32
    %c0_i32_1 = arith.constant 0 : i32
    return %arg0, %c0_i32, %c0_i32_0 : i32, i32, i32
  }
  func.func @transform_1(%arg0: i32, %arg1: i32) -> (i32, i32) {
    %c0_i32 = arith.constant 0 : i32
    %c0_i32_0 = arith.constant 0 : i32
    %c0_i32_1 = arith.constant 0 : i32
    return %c0_i32, %c0_i32_0 : i32, i32
  }
  func.func @transform_2(%arg0: i32, %arg1: i32) -> (i32, i32) {
    %c0_i32 = arith.constant 0 : i32
    %c0_i32_0 = arith.constant 0 : i32
    %c0_i32_1 = arith.constant 0 : i32
    return %c0_i32, %c0_i32_0 : i32, i32
  }
  func.func @transform_3(%arg0: i32, %arg1: i32) -> (i32, i32) {
    %c0_i32 = arith.constant 0 : i32
    %c0_i32_0 = arith.constant 0 : i32
    %c0_i32_1 = arith.constant 0 : i32
    return %c0_i32, %c0_i32_0 : i32, i32
  }
  func.func @transform_4(%arg0: i32, %arg1: i32) -> (i32, i32) {
    %c0_i32 = arith.constant 0 : i32
    %c0_i32_0 = arith.constant 0 : i32
    %c0_i32_1 = arith.constant 0 : i32
    return %c0_i32, %c0_i32_0 : i32, i32
  }
  func.func @transform_5(%arg0: i32, %arg1: i32) -> (i32, i32) {
    %c0_i32 = arith.constant 0 : i32
    %c0_i32_0 = arith.constant 0 : i32
    %c0_i32_1 = arith.constant 0 : i32
    return %c0_i32, %c0_i32_0 : i32, i32
  }
  func.func @transform_6(%arg0: i32, %arg1: i32) -> (i32, i32) {
    %c0_i32 = arith.constant 0 : i32
    %c0_i32_0 = arith.constant 0 : i32
    %c0_i32_1 = arith.constant 0 : i32
    return %c0_i32, %c0_i32_0 : i32, i32
  }
  func.func @transform_7(%arg0: i32, %arg1: i32) -> (i32, i32, i32) {
    %c0_i32 = arith.constant 0 : i32
    %c0_i32_0 = arith.constant 0 : i32
    return %arg0, %arg1, %c0_i32 : i32, i32, i32
  }
}

module attributes {stable_mosaic.version = 11 : i64} {
  func.func @mlp_kernel(%arg0: i32, %arg1: i32, %arg2: memref<1x64x128xbf16, #tpu.memory_space<vmem>>, %arg3: memref<128x128xbf16, #tpu.memory_space<vmem>>, %arg4: memref<1x128xf32, #tpu.memory_space<vmem>>, %arg5: memref<9x128xf32, #tpu.memory_space<vmem>>, %arg6: memref<1x128xf32, #tpu.memory_space<vmem>>, %arg7: memref<128x128xbf16, #tpu.memory_space<vmem>>, %arg8: memref<1x128xf32, #tpu.memory_space<vmem>>, %arg9: memref<1x32x128xf32, #tpu.memory_space<vmem>>, %arg10: memref<48x128xf32, #tpu.memory_space<vmem>>) attributes {dimension_semantics = [#tpu.dimension_semantics<parallel>, #tpu.dimension_semantics<parallel>], iteration_bounds = array<i64: 2, 2>, scalar_prefetch = 0 : i64, scratch_operands = 1 : i64, tpu.core_type = #tpu.core_type<tc>, window_params = [{transform_indices = @transform_0, window_bounds = array<i64: 1, 64, 128>}, {pipeline_mode = #tpu.pipeline_mode<synchronous>, transform_indices = @transform_1, window_bounds = array<i64: 128, 128>}, {pipeline_mode = #tpu.pipeline_mode<synchronous>, transform_indices = @transform_2, window_bounds = array<i64: 1, 128>}, {pipeline_mode = #tpu.pipeline_mode<synchronous>, transform_indices = @transform_3, window_bounds = array<i64: 9, 128>}, {pipeline_mode = #tpu.pipeline_mode<synchronous>, transform_indices = @transform_4, window_bounds = array<i64: 1, 128>}, {pipeline_mode = #tpu.pipeline_mode<synchronous>, transform_indices = @transform_5, window_bounds = array<i64: 128, 128>}, {pipeline_mode = #tpu.pipeline_mode<synchronous>, transform_indices = @transform_6, window_bounds = array<i64: 1, 128>}, {transform_indices = @transform_7, window_bounds = array<i64: 1, 32, 128>}]} {
    %c4_i32 = arith.constant 4 : i32
    %0 = arith.muli %arg1, %c4_i32 : i32
    %c1_i32 = arith.constant 1 : i32
    %1 = arith.subi %0, %c1_i32 : i32
    %c0_i32 = arith.constant 0 : i32
    %2 = arith.maxsi %1, %c0_i32 : i32
    %c4_i32_0 = arith.constant 4 : i32
    %3 = arith.addi %0, %c4_i32_0 : i32
    %c7_i32 = arith.constant 7 : i32
    %4 = arith.minsi %3, %c7_i32 : i32
    %c8_i32 = arith.constant 8 : i32
    %5 = arith.muli %2, %c8_i32 : i32
    %6 = tpu.assume_multiple %5, 8 : i32
    %c0 = arith.constant 0 : index
    %7 = arith.index_cast %6 : i32 to index
    %c0_1 = arith.constant 0 : index
    %8 = vector.load %arg2[%c0, %7, %c0_1] : memref<1x64x128xbf16, #tpu.memory_space<vmem>>, vector<1x8x128xbf16>
    %9 = vector.shape_cast %8 : vector<1x8x128xbf16> to vector<8x128xbf16>
    %c8_i32_2 = arith.constant 8 : i32
    %10 = arith.muli %0, %c8_i32_2 : i32
    %11 = tpu.assume_multiple %10, 32 : i32
    %c0_3 = arith.constant 0 : index
    %12 = arith.index_cast %11 : i32 to index
    %c0_4 = arith.constant 0 : index
    %13 = vector.load %arg2[%c0_3, %12, %c0_4] : memref<1x64x128xbf16, #tpu.memory_space<vmem>>, vector<1x32x128xbf16>
    %14 = vector.shape_cast %13 : vector<1x32x128xbf16> to vector<32x128xbf16>
    %c8_i32_5 = arith.constant 8 : i32
    %15 = arith.muli %4, %c8_i32_5 : i32
    %16 = tpu.assume_multiple %15, 8 : i32
    %c0_6 = arith.constant 0 : index
    %17 = arith.index_cast %16 : i32 to index
    %c0_7 = arith.constant 0 : index
    %18 = vector.load %arg2[%c0_6, %17, %c0_7] : memref<1x64x128xbf16, #tpu.memory_space<vmem>>, vector<1x8x128xbf16>
    %19 = vector.shape_cast %18 : vector<1x8x128xbf16> to vector<8x128xbf16>
    %20 = tpu.concatenate %9, %14, %19 in 0 : vector<8x128xbf16>, vector<32x128xbf16>, vector<8x128xbf16> -> vector<48x128xbf16>
    %c0_8 = arith.constant 0 : index
    %c0_9 = arith.constant 0 : index
    %21 = vector.load %arg3[%c0_8, %c0_9] : memref<128x128xbf16, #tpu.memory_space<vmem>>, vector<128x128xbf16>
    %cst = arith.constant dense<0.000000e+00> : vector<48x128xf32>
    %22 = tpu.matmul %20, %21, %cst {dimension_numbers = #tpu.dot_dimension_numbers<[1], [0], [0], [1], [0, 0, 1, 1], [], []>} : vector<48x128xbf16>, vector<128x128xbf16>, vector<48x128xf32> -> vector<48x128xf32>
    %c0_10 = arith.constant 0 : index
    %c0_11 = arith.constant 0 : index
    %23 = vector.load %arg4[%c0_10, %c0_11] : memref<1x128xf32, #tpu.memory_space<vmem>>, vector<1x128xf32>
    %24 = vector.broadcast %23 : vector<1x128xf32> to vector<48x128xf32>
    %25 = arith.addf %22, %24 : vector<48x128xf32>
    %cst_12 = arith.constant 0.000000e+00 : f32
    %26 = vector.broadcast %cst_12 : f32 to vector<48x128xf32>
    %27 = arith.maximumf %25, %26 : vector<48x128xf32>
    %c0_13 = arith.constant 0 : index
    %c0_14 = arith.constant 0 : index
    %28 = vector.load %arg10[%c0_13, %c0_14] : memref<48x128xf32, #tpu.memory_space<vmem>>, vector<48x128xf32>
    tpu.vector_store %arg10[%c0_13, %c0_14], %27 {strides = array<i32>} : memref<48x128xf32, #tpu.memory_space<vmem>>, vector<48x128xf32>,
    %c0_i32_15 = arith.constant 0 : i32
    %29 = arith.cmpi eq, %arg1, %c0_i32_15 : i32
    %30 = arith.extui %29 : i1 to i32
    %c0_i32_16 = arith.constant 0 : i32
    %31 = arith.cmpi ne, %30, %c0_i32_16 : i32
    scf.if %31 {
      %cst_47 = arith.constant 0.000000e+00 : f32
      %138 = vector.broadcast %cst_47 : f32 to vector<8x128xf32>
      %c0_48 = arith.constant 0 : index
      %c0_49 = arith.constant 0 : index
      %139 = vector.load %arg10[%c0_48, %c0_49] : memref<48x128xf32, #tpu.memory_space<vmem>>, vector<8x128xf32>
      tpu.vector_store %arg10[%c0_48, %c0_49], %138 {strides = array<i32>} : memref<48x128xf32, #tpu.memory_space<vmem>>, vector<8x128xf32>,
    } else {
    }
    %c1_i32_17 = arith.constant 1 : i32
    %32 = arith.cmpi eq, %arg1, %c1_i32_17 : i32
    %33 = arith.extui %32 : i1 to i32
    %c0_i32_18 = arith.constant 0 : i32
    %34 = arith.cmpi ne, %33, %c0_i32_18 : i32
    scf.if %34 {
      %cst_47 = arith.constant 0.000000e+00 : f32
      %138 = vector.broadcast %cst_47 : f32 to vector<8x128xf32>
      %c40 = arith.constant 40 : index
      %c0_48 = arith.constant 0 : index
      %139 = vector.load %arg10[%c40, %c0_48] : memref<48x128xf32, #tpu.memory_space<vmem>>, vector<8x128xf32>
      tpu.vector_store %arg10[%c40, %c0_48], %138 {strides = array<i32>} : memref<48x128xf32, #tpu.memory_space<vmem>>, vector<8x128xf32>,
    } else {
    }
    %c0_19 = arith.constant 0 : index
    %c0_20 = arith.constant 0 : index
    %35 = vector.load %arg10[%c0_19, %c0_20] : memref<48x128xf32, #tpu.memory_space<vmem>>, vector<48x128xf32>
    %36 = tpu.iota {dimensions = array<i32: 0>} : vector<48x1xi32>
    %c8_i32_21 = arith.constant 8 : i32
    %c0_i32_22 = arith.constant 0 : i32
    %37 = arith.cmpi eq, %c8_i32_21, %c0_i32_22 : i32
    %c1_i32_23 = arith.constant 1 : i32
    %38 = arith.select %37, %c1_i32_23, %c8_i32_21 : i32
    %39 = vector.broadcast %38 : i32 to vector<48x1xi32>
    %40 = arith.remsi %36, %39 : vector<48x1xi32>
    %c0_i32_24 = arith.constant 0 : i32
    %41 = vector.broadcast %c0_i32_24 : i32 to vector<48x1xi32>
    %42 = arith.cmpi ne, %40, %41 : vector<48x1xi32>
    %c0_i32_25 = arith.constant 0 : i32
    %43 = vector.broadcast %c0_i32_25 : i32 to vector<48x1xi32>
    %44 = arith.cmpi slt, %40, %43 : vector<48x1xi32>
    %c0_i32_26 = arith.constant 0 : i32
    %45 = arith.cmpi slt, %38, %c0_i32_26 : i32
    %46 = vector.broadcast %45 : i1 to vector<48x1xi1>
    %47 = vector.broadcast %46 : vector<48x1xi1> to vector<48x1xi1>
    %48 = arith.xori %44, %47 : vector<48x1xi1>
    %49 = arith.andi %48, %42 : vector<48x1xi1>
    %50 = vector.broadcast %38 : i32 to vector<48x1xi32>
    %51 = arith.addi %40, %50 : vector<48x1xi32>
    %52 = arith.select %49, %51, %40 : vector<48x1xi1>, vector<48x1xi32>
    %c1_i32_27 = arith.constant 1 : i32
    %53 = vector.broadcast %c1_i32_27 : i32 to vector<48x1xi32>
    %54 = arith.cmpi sge, %52, %53 : vector<48x1xi32>
    %c1_i32_28 = arith.constant 1 : i32
    %55 = tpu.dynamic_rotate %35 by %c1_i32_28 dim 0 : vector<48x128xf32>, i32 -> vector<48x128xf32>
    %cst_29 = arith.constant 0.000000e+00 : f32
    %56 = vector.shape_cast %54 : vector<48x1xi1> to vector<48x1xi1>
    %57 = vector.broadcast %56 : vector<48x1xi1> to vector<48x128xi1>
    %58 = vector.broadcast %cst_29 : f32 to vector<48x128xf32>
    %59 = arith.select %57, %55, %58 : vector<48x128xi1>, vector<48x128xf32>
    %c6_i32 = arith.constant 6 : i32
    %60 = vector.broadcast %c6_i32 : i32 to vector<48x1xi32>
    %61 = arith.cmpi sle, %52, %60 : vector<48x1xi32>
    %c47_i32 = arith.constant 47 : i32
    %62 = tpu.dynamic_rotate %35 by %c47_i32 dim 0 : vector<48x128xf32>, i32 -> vector<48x128xf32>
    %cst_30 = arith.constant 0.000000e+00 : f32
    %63 = vector.shape_cast %61 : vector<48x1xi1> to vector<48x1xi1>
    %64 = vector.broadcast %63 : vector<48x1xi1> to vector<48x128xi1>
    %65 = vector.broadcast %cst_30 : f32 to vector<48x128xf32>
    %66 = arith.select %64, %62, %65 : vector<48x128xi1>, vector<48x128xf32>
    %c0_31 = arith.constant 0 : index
    %c0_32 = arith.constant 0 : index
    %67 = vector.load %arg5[%c0_31, %c0_32] : memref<9x128xf32, #tpu.memory_space<vmem>>, vector<9x128xf32>
    %c0_33 = arith.constant 0 : index
    %c0_34 = arith.constant 0 : index
    %68 = vector.load %arg6[%c0_33, %c0_34] : memref<1x128xf32, #tpu.memory_space<vmem>>, vector<1x128xf32>
    %69 = vector.shape_cast %68 : vector<1x128xf32> to vector<1x128xf32>
    %70 = vector.broadcast %69 : vector<1x128xf32> to vector<32x128xf32>
    %71 = vector.extract_strided_slice %59 {offsets = [0, 0], sizes = [32, 128], strides = [1, 1]} : vector<48x128xf32> to vector<32x128xf32>
    %72 = vector.extract_strided_slice %67 {offsets = [0, 0], sizes = [1, 128], strides = [1, 1]} : vector<9x128xf32> to vector<1x128xf32>
    %73 = vector.broadcast %72 : vector<1x128xf32> to vector<32x128xf32>
    %74 = arith.mulf %71, %73 : vector<32x128xf32>
    %75 = arith.addf %70, %74 : vector<32x128xf32>
    %76 = vector.extract_strided_slice %35 {offsets = [0, 0], sizes = [32, 128], strides = [1, 1]} : vector<48x128xf32> to vector<32x128xf32>
    %77 = vector.extract_strided_slice %67 {offsets = [1, 0], sizes = [1, 128], strides = [1, 1]} : vector<9x128xf32> to vector<1x128xf32>
    %78 = vector.broadcast %77 : vector<1x128xf32> to vector<32x128xf32>
    %79 = arith.mulf %76, %78 : vector<32x128xf32>
    %80 = arith.addf %75, %79 : vector<32x128xf32>
    %81 = vector.extract_strided_slice %66 {offsets = [0, 0], sizes = [32, 128], strides = [1, 1]} : vector<48x128xf32> to vector<32x128xf32>
    %82 = vector.extract_strided_slice %67 {offsets = [2, 0], sizes = [1, 128], strides = [1, 1]} : vector<9x128xf32> to vector<1x128xf32>
    %83 = vector.broadcast %82 : vector<1x128xf32> to vector<32x128xf32>
    %84 = arith.mulf %81, %83 : vector<32x128xf32>
    %85 = arith.addf %80, %84 : vector<32x128xf32>
    %86 = vector.extract_strided_slice %59 {offsets = [8, 0], sizes = [32, 128], strides = [1, 1]} : vector<48x128xf32> to vector<32x128xf32>
    %87 = vector.extract_strided_slice %67 {offsets = [3, 0], sizes = [1, 128], strides = [1, 1]} : vector<9x128xf32> to vector<1x128xf32>
    %88 = vector.broadcast %87 : vector<1x128xf32> to vector<32x128xf32>
    %89 = arith.mulf %86, %88 : vector<32x128xf32>
    %90 = arith.addf %85, %89 : vector<32x128xf32>
    %91 = vector.extract_strided_slice %35 {offsets = [8, 0], sizes = [32, 128], strides = [1, 1]} : vector<48x128xf32> to vector<32x128xf32>
    %92 = vector.extract_strided_slice %67 {offsets = [4, 0], sizes = [1, 128], strides = [1, 1]} : vector<9x128xf32> to vector<1x128xf32>
    %93 = vector.broadcast %92 : vector<1x128xf32> to vector<32x128xf32>
    %94 = arith.mulf %91, %93 : vector<32x128xf32>
    %95 = arith.addf %90, %94 : vector<32x128xf32>
    %96 = vector.extract_strided_slice %66 {offsets = [8, 0], sizes = [32, 128], strides = [1, 1]} : vector<48x128xf32> to vector<32x128xf32>
    %97 = vector.extract_strided_slice %67 {offsets = [5, 0], sizes = [1, 128], strides = [1, 1]} : vector<9x128xf32> to vector<1x128xf32>
    %98 = vector.broadcast %97 : vector<1x128xf32> to vector<32x128xf32>
    %99 = arith.mulf %96, %98 : vector<32x128xf32>
    %100 = arith.addf %95, %99 : vector<32x128xf32>
    %101 = vector.extract_strided_slice %59 {offsets = [16, 0], sizes = [32, 128], strides = [1, 1]} : vector<48x128xf32> to vector<32x128xf32>
    %102 = vector.extract_strided_slice %67 {offsets = [6, 0], sizes = [1, 128], strides = [1, 1]} : vector<9x128xf32> to vector<1x128xf32>
    %103 = vector.broadcast %102 : vector<1x128xf32> to vector<32x128xf32>
    %104 = arith.mulf %101, %103 : vector<32x128xf32>
    %105 = arith.addf %100, %104 : vector<32x128xf32>
    %106 = vector.extract_strided_slice %35 {offsets = [16, 0], sizes = [32, 128], strides = [1, 1]} : vector<48x128xf32> to vector<32x128xf32>
    %107 = vector.extract_strided_slice %67 {offsets = [7, 0], sizes = [1, 128], strides = [1, 1]} : vector<9x128xf32> to vector<1x128xf32>
    %108 = vector.broadcast %107 : vector<1x128xf32> to vector<32x128xf32>
    %109 = arith.mulf %106, %108 : vector<32x128xf32>
    %110 = arith.addf %105, %109 : vector<32x128xf32>
    %111 = vector.extract_strided_slice %66 {offsets = [16, 0], sizes = [32, 128], strides = [1, 1]} : vector<48x128xf32> to vector<32x128xf32>
    %112 = vector.extract_strided_slice %67 {offsets = [8, 0], sizes = [1, 128], strides = [1, 1]} : vector<9x128xf32> to vector<1x128xf32>
    %113 = vector.broadcast %112 : vector<1x128xf32> to vector<32x128xf32>
    %114 = arith.mulf %111, %113 : vector<32x128xf32>
    %115 = arith.addf %110, %114 : vector<32x128xf32>
    %116 = arith.mulf %115, %115 : vector<32x128xf32>
    %117 = arith.mulf %116, %115 : vector<32x128xf32>
    %cst_35 = arith.constant 4.471500e-02 : f32
    %118 = vector.broadcast %cst_35 : f32 to vector<32x128xf32>
    %119 = arith.mulf %118, %117 : vector<32x128xf32>
    %120 = arith.addf %115, %119 : vector<32x128xf32>
    %cst_36 = arith.constant 5.000000e-01 : f32
    %121 = vector.broadcast %cst_36 : f32 to vector<32x128xf32>
    %122 = arith.mulf %121, %115 : vector<32x128xf32>
    %cst_37 = arith.constant 0.797884583 : f32
    %123 = vector.broadcast %cst_37 : f32 to vector<32x128xf32>
    %124 = arith.mulf %123, %120 : vector<32x128xf32>
    %125 = math.tanh %124 : vector<32x128xf32>
    %cst_38 = arith.constant 1.000000e+00 : f32
    %126 = vector.broadcast %cst_38 : f32 to vector<32x128xf32>
    %127 = arith.addf %126, %125 : vector<32x128xf32>
    %128 = arith.mulf %122, %127 : vector<32x128xf32>
    %129 = arith.truncf %128 : vector<32x128xf32> to vector<32x128xbf16>
    %c0_39 = arith.constant 0 : index
    %c0_40 = arith.constant 0 : index
    %130 = vector.load %arg7[%c0_39, %c0_40] : memref<128x128xbf16, #tpu.memory_space<vmem>>, vector<128x128xbf16>
    %cst_41 = arith.constant dense<0.000000e+00> : vector<32x128xf32>
    %131 = tpu.matmul %129, %130, %cst_41 {dimension_numbers = #tpu.dot_dimension_numbers<[1], [0], [0], [1], [0, 0, 1, 1], [], []>} : vector<32x128xbf16>, vector<128x128xbf16>, vector<32x128xf32> -> vector<32x128xf32>
    %c0_42 = arith.constant 0 : index
    %c0_43 = arith.constant 0 : index
    %132 = vector.load %arg8[%c0_42, %c0_43] : memref<1x128xf32, #tpu.memory_space<vmem>>, vector<1x128xf32>
    %133 = vector.broadcast %132 : vector<1x128xf32> to vector<32x128xf32>
    %134 = arith.addf %131, %133 : vector<32x128xf32>
    %c0_44 = arith.constant 0 : index
    %c0_45 = arith.constant 0 : index
    %c0_46 = arith.constant 0 : index
    %135 = vector.load %arg9[%c0_44, %c0_45, %c0_46] : memref<1x32x128xf32, #tpu.memory_space<vmem>>, vector<1x32x128xf32>
    %136 = vector.shape_cast %135 : vector<1x32x128xf32> to vector<32x128xf32>
    %137 = vector.shape_cast %134 : vector<32x128xf32> to vector<1x32x128xf32>
    tpu.vector_store %arg9[%c0_44, %c0_45, %c0_46], %137 {strides = array<i32>} : memref<1x32x128xf32, #tpu.memory_space<vmem>>, vector<1x32x128xf32>,
    return
  }
  func.func @transform_0(%arg0: i32, %arg1: i32) -> (i32, i32, i32) {
    %c0_i32 = arith.constant 0 : i32
    %c0_i32_0 = arith.constant 0 : i32
    %c0_i32_1 = arith.constant 0 : i32
    return %arg0, %c0_i32, %c0_i32_0 : i32, i32, i32
  }
  func.func @transform_1(%arg0: i32, %arg1: i32) -> (i32, i32) {
    %c0_i32 = arith.constant 0 : i32
    %c0_i32_0 = arith.constant 0 : i32
    %c0_i32_1 = arith.constant 0 : i32
    return %c0_i32, %c0_i32_0 : i32, i32
  }
  func.func @transform_2(%arg0: i32, %arg1: i32) -> (i32, i32) {
    %c0_i32 = arith.constant 0 : i32
    %c0_i32_0 = arith.constant 0 : i32
    %c0_i32_1 = arith.constant 0 : i32
    return %c0_i32, %c0_i32_0 : i32, i32
  }
  func.func @transform_3(%arg0: i32, %arg1: i32) -> (i32, i32) {
    %c0_i32 = arith.constant 0 : i32
    %c0_i32_0 = arith.constant 0 : i32
    %c0_i32_1 = arith.constant 0 : i32
    return %c0_i32, %c0_i32_0 : i32, i32
  }
  func.func @transform_4(%arg0: i32, %arg1: i32) -> (i32, i32) {
    %c0_i32 = arith.constant 0 : i32
    %c0_i32_0 = arith.constant 0 : i32
    %c0_i32_1 = arith.constant 0 : i32
    return %c0_i32, %c0_i32_0 : i32, i32
  }
  func.func @transform_5(%arg0: i32, %arg1: i32) -> (i32, i32) {
    %c0_i32 = arith.constant 0 : i32
    %c0_i32_0 = arith.constant 0 : i32
    %c0_i32_1 = arith.constant 0 : i32
    return %c0_i32, %c0_i32_0 : i32, i32
  }
  func.func @transform_6(%arg0: i32, %arg1: i32) -> (i32, i32) {
    %c0_i32 = arith.constant 0 : i32
    %c0_i32_0 = arith.constant 0 : i32
    %c0_i32_1 = arith.constant 0 : i32
    return %c0_i32, %c0_i32_0 : i32, i32
  }
  func.func @transform_7(%arg0: i32, %arg1: i32) -> (i32, i32, i32) {
    %c0_i32 = arith.constant 0 : i32
    %c0_i32_0 = arith.constant 0 : i32
    return %arg0, %arg1, %c0_i32 : i32, i32, i32
  }
}

</mosaic_0001>

<bundles_post_ra>
// kernel: tpu_custom_call.1
= control target key start
LH: loop header
LB: loop body
LE: loop exit
PB: predicated region body
PF: predicated region fallthrough
CT: control target
= control target key end

     0   :  { %s2234_s0 = inlined_call_operand.hbm [shape: bf16[2,64,128], index: 0, kind: input, shape index: {}]   ;;  %s2235_s1 = inlined_call_operand.hbm [shape: bf16[128,128], index: 1, kind: input, shape index: {}]   ;;  %s2236_s2 = inlined_call_operand.vmem [shape: f32[1,128], index: 2, kind: input, shape index: {}]   ;;  %s2237_s3 = inlined_call_operand.hbm [shape: f32[9,128], index: 3, kind: input, shape index: {}]   ;;  %s2238_s4 = inlined_call_operand.vmem [shape: f32[1,128], index: 4, kind: input, shape index: {}]   ;;  %s2239_s5 = inlined_call_operand.hbm [shape: bf16[128,128], index: 5, kind: input, shape index: {}]   ;;  %s2240_s6 = inlined_call_operand.vmem [shape: f32[1,128], index: 6, kind: input, shape index: {}]   ;;  %s2241_s7 = inlined_call_operand.hbm [shape: f32[2,64,128], index: 7, kind: output, shape index: {}]  }
   0x1   :  { %2264 = sst [smem:[#allocation27_spill]] %s2234_s0 }
   0x2   :  { %12 = vsyncpa [#allocation4], 0 }
   0x3   :  { %13 = vsyncpa [#allocation7], 0 }
   0x4   :  { %14 = vsyncpa [#allocation10], 0 }
   0x5   :  { %15 = vsyncpa [#allocation5], 0 }
   0x6   :  { %17 = vsyncpa [#allocation5 + $0x1], 0  ;;  %s1703_s24 = smov 0   ;;  %s1705_s25 = smov 0  }
   0x7   :  { %s1707_s26 = smov 0   ;;  %s1709_s27 = smov 0  }
   0x8   :  { %s1711_s28 = smov 0   ;;  %s1713_s29 = smov 0  }
   0x9   :  { %s1715_s30 = smov 0   ;;  %s1717_s8 = smov 0  }
   0xa   :  { %s1719_s9 = smov 0   ;;  %s1721_s10 = smov 0  }
   0xb   :  { %s1723_s11 = smov 0  }
   0xc LB: > { %2265 = sst [smem:[#allocation16_spill]] %s1606_s24  ;;  %s1109_s12 = sadd.s32 4294967295, %s1646_s11   ;;  %s1646_s11 = sphi %s1723_s11, %s23_s11   ;;  %s1642_s10 = sphi %s1721_s10, %s2325_s10   ;;  %s1638_s9 = sphi %s1719_s9, %s2324_s9   ;;  %s1634_s8 = sphi %s1717_s8, %s2328_s8   ;;  %s1630_s30 = sphi %s1715_s30, %s2322_s30   ;;  %s1626_s29 = sphi %s1713_s29, %s2321_s29   ;;  %s1622_s28 = sphi %s1711_s28, %s2320_s28   ;;  %s1618_s27 = sphi %s1709_s27, %s2319_s27   ;;  %s1614_s26 = sphi %s1707_s26, %s2318_s26   ;;  %s1610_s25 = sphi %s1705_s25, %s2327_s25   ;;  %s1606_s24 = sphi %s1703_s24, %s2326_s24  }
   0xd   : > { %2266 = sst [smem:[#allocation17_spill]] %s1614_s26  ;;  %s1110_s13 = sadd.s32 4294967294, %s1646_s11  }
   0xe   : > { %2267 = sst [smem:[#allocation18_spill]] %s1622_s28  ;;  %s32_s14 = sadd.s32 1, %s1638_s9 }
   0xf   : > { %2268 = sst [smem:[#allocation19_spill]] %s1626_s29  ;;  %s35_s15 = sadd.s32 1, %s1642_s10 }
  0x10   : > { %2269 = sst [smem:[#allocation20_spill]] %s1638_s9  ;;  %p33_p0 = scmp.ge.s32.totalorder %s32_s14, 2 }
  0x11   : > { %2270 = sst [smem:[#allocation21_spill]] %s1642_s10  ;;  %s42_s16 = sadd.s32 1, %s1626_s29 }
  0x12   : > { %p55_p1 = scmp.ne.s32.totalorder %s1622_s28, %s1618_s27  ;;  %p1762_p2 = scmp.eq.s32.totalorder %s1109_s12, 0 }
  0x13   : > { %s2330_s14 = smov (%p33_p0, %s32_s14), 0  ;;  %s2332_s15 = smov (!%p33_p0, %s35_s15), %s1642_s10 }
  0x14   : > { %s2271_s17 = scalar_select %p1762_p2, 1, 0 }
  0x15   : > { %2272 = sst [smem:[#allocation22_spill]] %s2330_s14  ;;  %p1771_p3 = por %p1762_p2, %p55_p1 }
  0x16   : > { %s192_s19 = ssub.s32 %s1638_s9, %s2330_s14  ;;  %p37_p4 = scmp.ge.s32.totalorder %s2332_s15, 2 }
  0x17   : > { %s2273_s18 = scalar_select %p1771_p3, 1, 0 }
  0x18   : > { %s196_s20 = sadd.s32 1, %s1614_s26  ;;  %p206_p5 = scmp.ne.s32.totalorder %s1614_s26, %s1610_s25 }
  0x19   : > { %p207_p6 = scmp.eq.s32.totalorder %s1109_s12, 3  ;;  %s2334_s15 = smov (%p37_p4, %s2332_s15), 0 }
  0x1a   : > { %2274 = sst [smem:[#allocation23_spill]] %s2334_s15  ;;  %p212_p8 = scmp.ne.s32.totalorder %s1610_s25, %s1606_s24 }
  0x1b   : > { %p1782_p7 = por %p207_p6, %p206_p5  ;;  %s39_s22 = ssub.s32 %s1642_s10, %s2334_s15 }
  0x1c   : > { %p213_p9 = scmp.eq.s32.totalorder %s1110_s13, 3  ;;  %p40_p10 = scmp.eq.s32.totalorder %s39_s22, 0 }
  0x1d   : > { %s2275_s21 = scalar_select %p1782_p7, 1, 0 }
  0x1e   : > { %s193_s23 = sor.u32 %s192_s19, %s39_s22  ;;  %p1790_p12 = por %p213_p9, %p212_p8 }
  0x1f   : > { %p194_p11 = scmp.eq.s32.totalorder %s193_s23, 0  ;;  %p1111_p13 = scmp.ge.s32.totalorder %s1646_s11, 1 }
  0x20   : > { %s2276_s27 = scalar_select %p1790_p12, 1, 0 }
  0x21   : > { %s1795_s12 = scalar_select %p40_p10, %s1626_s29, %s42_s16  }
  0x22   : > { %2277 = sst [smem:[#allocation24_spill]] %s2276_s27  ;;  %p220_p0 = scmp.lt.s32.totalorder %s1646_s11, 5 }
  0x23   : > { %2278 = sst [smem:[#allocation25_spill]] %s1795_s12  ;;  %s1648_s13 = smov [#allocation6]  }
  0x24   : > { %s1798_s14 = scalar_select %p194_p11, %s1614_s26, %s196_s20  }
  0x25   : > { %p1802_p1 = pnand %p1111_p13, %p220_p0  ;;  %s248_s19 = sshll.u32 %s1648_s13, 4  ;;  %s249_s19 = int_to_ptr.vmem [resolvable:$true] %s248_s19 }
  0x26   : > { %2279 = sst [smem:[#allocation26_spill]] %s1798_s14  ;;  %s1402_s15 = scalar_lea.hbm %s2235_s1, 1024 }
  0x27   : > { %s2280_s9 = scalar_select %p1802_p1, 1, 0 }
  0x28   : > { %p1248_p4 = pneg %p1802_p1  ;;  %p1403_p8 = scmp.ne.s32.totalorder %s2235_s1, %s1402_s15 }
  0x29   : > { %p1409_p13 = scmp.lt.u32.totalorder %s1402_s15, %s2235_s1 }
  0x2a   : > { %p1810_p5 = pnand %p1248_p4, %p1771_p3  ;;  %p1816_p6 = pnand %p1248_p4, %p1762_p2 }
  0x2c   : > { %s2281_s22 = scalar_select %p1810_p5, 1, 0 }
  0x2d   : > { %s2282_s16 = scalar_select %p1816_p6, 1, 0 }
  0x2e   : > { %p1828_p9 = pneg %p1816_p6 }
  0x30   : > { %s2283_s13 = scalar_select %p1828_p9, 1, 0 }
  0x31   : > { %p1405_p10 = pnand %p1828_p9, %p1403_p8 }
  0x33   : > { %p1406_p11 = pneg %p1405_p10 }
  0x35   : > { %p1411_p0 = pnand %p1409_p13, %p1406_p11 }
  0x37   : > { %1414 = shalt.err (!%p1411_p0)
}
  0x38   : > { %s1415_s20 = scalar_lea.vmem %s249_s19, 1024  ;;  %p1423_p2 = scmp.lt.s32.totalorder %s249_s19, %s249_s19 }
  0x39   : > { %p1416_p4 = scmp.ne.s32.totalorder %s249_s19, %s1415_s20  ;;  %p1424_p3 = scmp.lt.s32.totalorder %s1415_s20, %s1415_s20 }
  0x3b   : > { %p1418_p12 = pnand %p1416_p4, %p1828_p9  ;;  %p1425_p1 = por %p1424_p3, %p1423_p2 }
  0x3d   : > { %p1419_p7 = pneg %p1418_p12 }
  0x3f   : > { %p1426_p5 = pnand %p1425_p1, %p1419_p7 }
  0x41   : > { %1429 = shalt.err (!%p1426_p5)
}
  0x42   : > { %s2262_s10 = smov 64   ;;  %s2263_s28 = smov 4  }
  0x43   : > { %1254 = dma.hbm_to_vmem [thread:$0]  (!%p1816_p6), %s2235_s1, 1024, %s249_s19, [#allocation7], %s2262_s10, %s2262_s10, %s2263_s28  }
  0x44   : > { %s1162_s12 = sshll.u32 %s1634_s8, 9  ;;  %s2284_s0 = sld [smem:[#allocation27_spill]] }
  0x45   : > { %s1651_s26 = smov [#allocation3]   ;;  %p2285_p3 = scmp.ne.s32.totalorder %s2281_s22, 0 }
  0x46   : > { %s235_s27 = sshll.u32 %s1651_s26, 4  ;;  %s236_s27 = int_to_ptr.vmem [resolvable:$true] %s235_s27 }
  0x47   : > { %p1432_p7 = pneg %p2285_p3 }
  0x4a   : > { %s1851_s14 = scalar_lea.hbm %s2284_s0, %s1162_s12  ;;  %s1435_s15 = scalar_lea.hbm %s2284_s0, 1024 }
  0x4b   : > { %s1430_s24 = scalar_lea.hbm %s1851_s14, 512  ;;  %p1436_p5 = scmp.lt.u32.totalorder %s1851_s14, %s2284_s0 }
  0x4c   : > { %p1431_p2 = scmp.ne.s32.totalorder %s1851_s14, %s1430_s24  ;;  %p1437_p8 = scmp.lt.u32.totalorder %s1435_s15, %s1430_s24 }
  0x4d   : > { %p1439_p11 = scmp.lt.u32.totalorder %s1430_s24, %s1851_s14 }
  0x4e   : > { %p1433_p12 = pnand %p1432_p7, %p1431_p2  ;;  %p1438_p10 = por %p1437_p8, %p1436_p5 }
  0x50   : > { %p1434_p1 = pneg %p1433_p12  ;;  %p1440_p13 = por %p1439_p11, %p1438_p10 }
  0x52   : > { %p1441_p0 = pnand %p1440_p13, %p1434_p1 }
  0x54   : > { %1444 = shalt.err (!%p1441_p0)
}
  0x55   : > { %s1445_s26 = scalar_lea.vmem %s236_s27, 512  ;;  %p1453_p6 = scmp.lt.s32.totalorder %s236_s27, %s236_s27 }
  0x56   : > { %p1446_p4 = scmp.ne.s32.totalorder %s236_s27, %s1445_s26  ;;  %p1454_p9 = scmp.lt.s32.totalorder %s1445_s26, %s1445_s26 }
  0x58   : > { %p1448_p2 = pnand %p1446_p4, %p1432_p7  ;;  %p1455_p5 = por %p1454_p9, %p1453_p6 }
  0x5a   : > { %p1449_p12 = pneg %p1448_p2 }
  0x5c   : > { %p1456_p8 = pnand %p1455_p5, %p1449_p12 }
  0x5e   : > { %1459 = shalt.err (!%p1456_p8)
}
  0x5f   : > { %1251 = dma.hbm_to_vmem [thread:$0]  (!%p2285_p3), %s1851_s14, 512, %s236_s27, [#allocation4], %s2262_s10, %s2262_s10, %s2263_s28  }
  0x60   : > { %s1652_s24 = smov [#allocation8]   ;;  %s1460_s15 = scalar_lea.hbm %s2237_s3, 256 }
  0x61   : > { %s264_s20 = sshll.u32 %s1652_s24, 4  ;;  %p1461_p6 = scmp.ne.s32.totalorder %s2237_s3, %s1460_s15  ;;  %s265_s20 = int_to_ptr.vmem [resolvable:$true] %s264_s20 }
  0x62   : > { %p2286_p9 = scmp.ne.s32.totalorder %s2283_s13, 0  ;;  %p1467_p10 = scmp.lt.u32.totalorder %s1460_s15, %s2237_s3 }
  0x64   : > { %p1463_p7 = pnand %p1461_p6, %p2286_p9 }
  0x66   : > { %p1464_p1 = pneg %p1463_p7 }
  0x68   : > { %p1469_p11 = pnand %p1467_p10, %p1464_p1 }
  0x6a   : > { %1472 = shalt.err (!%p1469_p11)
}
  0x6b   : > { %s1473_s14 = scalar_lea.vmem %s265_s20, 256  ;;  %p1481_p4 = scmp.lt.s32.totalorder %s265_s20, %s265_s20 }
  0x6c   : > { %p1474_p3 = scmp.ne.s32.totalorder %s265_s20, %s1473_s14  ;;  %p1482_p2 = scmp.lt.s32.totalorder %s1473_s14, %s1473_s14 }
  0x6e   : > { %p1476_p13 = pnand %p1474_p3, %p2286_p9  ;;  %p1483_p12 = por %p1482_p2, %p1481_p4 }
  0x70   : > { %p1477_p0 = pneg %p1476_p13 }
  0x72   : > { %p1484_p5 = pnand %p1483_p12, %p1477_p0 }
  0x74   : > { %1487 = shalt.err (!%p1484_p5)
}
  0x75   : > { %s1653_s27 = smov 128   ;;  %s1654_s24 = smov 8  }
  0x76   : > { %p2287_p8 = scmp.ne.s32.totalorder %s2282_s16, 0  ;;  %s1655_s15 = smov [#allocation9]  }
  0x77   : > { %s280_s12 = sshll.u32 %s1655_s15, 4  ;;  %s1488_s26 = scalar_lea.hbm %s2239_s5, 1024  ;;  %s281_s12 = int_to_ptr.vmem [resolvable:$true] %s280_s12 }
  0x78   : > { %1257 = dma.hbm_to_vmem [thread:$0]  (!%p2287_p8), %s2237_s3, 256, %s265_s20, [#allocation7], %s1653_s27, %s1653_s27, %s1654_s24  }
  0x79   : > { %p1489_p6 = scmp.ne.s32.totalorder %s2239_s5, %s1488_s26  ;;  %p1495_p10 = scmp.lt.u32.totalorder %s1488_s26, %s2239_s5 }
  0x7b   : > { %p1491_p7 = pnand %p1489_p6, %p2286_p9 }
  0x7d   : > { %p1492_p1 = pneg %p1491_p7 }
  0x7f   : > { %p1497_p11 = pnand %p1495_p10, %p1492_p1 }
  0x81   : > { %1500 = shalt.err (!%p1497_p11)
}
  0x82   : > { %s1501_s20 = scalar_lea.vmem %s281_s12, 1024  ;;  %p1509_p4 = scmp.lt.s32.totalorder %s281_s12, %s281_s12 }
  0x83   : > { %p1502_p3 = scmp.ne.s32.totalorder %s281_s12, %s1501_s20  ;;  %p1510_p2 = scmp.lt.s32.totalorder %s1501_s20, %s1501_s20 }
  0x85   : > { %p1504_p13 = pnand %p1502_p3, %p2286_p9  ;;  %p1511_p12 = por %p1510_p2, %p1509_p4 }
  0x87   : > { %p1505_p0 = pneg %p1504_p13 }
  0x89   : > { %p1512_p5 = pnand %p1511_p12, %p1505_p0 }
  0x8b   : > { %1515 = shalt.err (!%p1512_p5)
}
  0x8c   : > { %s2288_s10 = smov 4   ;;  %s2289_s27 = smov 64  }
  0x8d   : > { %1260 = dma.hbm_to_vmem [thread:$0]  (!%p2287_p8), %s2239_s5, 1024, %s281_s12, [#allocation10], %s2289_s27, %s2289_s27, %s2288_s10  }
  0x8e   : > { %p2290_p6 = scmp.ne.s32.totalorder %s2280_s9, 0 }
  0x8f   : > { %p2291_p9 = scmp.ne.s32.totalorder (!%p2290_p6), %s2273_s18, 0 }
  0x90   : > { %299 = sbr.rel (%p2290_p6) target bundleno = 740 (0x2e4), region = 48 }
  0x97   : > { %1589 = dma.done.wait (%p2291_p9), [#allocation4], 512  }
  0x98   : > { %1591 = vsyncadd (%p2291_p9), [#allocation4], 4294966784  ;;  %p2292_p7 = scmp.ne.s32.totalorder %s2271_s17, 0 }
  0x9a   : > { %1593 = dma.done.wait (%p2292_p7), [#allocation7], 1280  }
  0x9b   : > { %1595 = vsyncadd (%p2292_p7), [#allocation7], 4294966016 }
  0x9c   : > { %1597 = dma.done.wait (%p2292_p7), [#allocation10], 1024  }
  0x9d   : > { %1599 = vsyncadd (%p2292_p7), [#allocation10], 4294966272  ;;  %s335_s9 = sand.u32 1, %s1610_s25   ;;  %v1656_v0 = vmov 0.0   ;;  %vm1657_vm0 = vmmov 0   ;;  %s1937_s16 = sshll.u32 %s1630_s30, 2 }
  0x9e   : > { %s1933_s18 = sshll.u32 %s335_s9, 5  ;;  %1184 = vmatprep.subr.bf16.mxu0 %v1656_v0  ;;  %1200 = vmatprep.mubr.msk.bf16.mxu0 %vm1657_vm0, %v1656_v0  ;;  %s344_s13 = sadd.s32 4, %s1937_s16  ;;  %v1374_v1 = vld [vmem:[#allocation6] sm:$0xff]   ;;  %v1375_v2 = vld [vmem:[#allocation6 + $0x8] sm:$0xff]   ;;  %v1376_v3 = vld [vmem:[#allocation6 + $0x10] sm:$0xff]   ;;  %vm383_vm1 = vcmask 1043456  }
  0x9f   : > { %s1126_s17 = sshll.u32 %s1630_s30, 5  ;;  %p345_p8 = scmp.lt.s32.totalorder %s344_s13, 7  ;;  %1185 = vmatpush3.bf16.msra.mxu0 %v1374_v1  ;;  %v1377_v4 = vld [vmem:[#allocation6 + $0x18] sm:$0xff]   ;;  %v1378_v5 = vld [vmem:[#allocation6 + $0x20] sm:$0xff]   ;;  %v1379_v6 = vld [vmem:[#allocation6 + $0x28] sm:$0xff]  }
  0xa0   : > { %s354_s24 = sshra.s32 %s1126_s17, 3  ;;  %s1123_s19 = sadd.s32 4294967295, %s1937_s16  ;;  %1186 = vmatprep.subr.bf16.mxu0 %v1656_v0  ;;  %v1380_v7 = vld [vmem:[#allocation6 + $0x30] sm:$0xff]   ;;  %v1381_v8 = vld [vmem:[#allocation6 + $0x38] sm:$0xff]  }
  0xa1   : > { %s1127_s29 = sshll.u32 %s354_s24, 2  ;;  %s2336_s13 = smov (!%p345_p8, %s344_s13), 7  ;;  %v1134_v16 = vld [vmem:[%s2236_s2] ss:$0 sm:$0xff] }
  0xa2   : > { %p342_p1 = scmp.gt.s32.totalorder %s1123_s19, 0  ;;  %s1128_s15 = sshll.u32 %s2336_s13, 3 }
  0xa3   : > { %1187 = vmatpush3.bf16.msra.mxu0 %v1375_v2  ;;  %s363_s12 = sshra.s32 %s1128_s15, 3  ;;  %s1942_s23 = scalar_lea.vmem [#allocation3], %s1127_s29 }
  0xa4   : > { %1188 = vmatprep.subr.bf16.mxu0 %v1656_v0  ;;  %s1129_s22 = sshll.u32 %s363_s12, 2  ;;  %s2338_s19 = smov (!%p342_p1, %s1123_s19), 0  ;;  %v1382_v9 = vld [vmem:[%s1942_s23] ss:$0 sps:$4 sm:$0xff]   ;;  %v1383_v12 = vld [vmem:[%s1942_s23 + $0x4] sm:$0xff]  }
  0xa5   : > { %s366_s26 = scalar_lea.vmem [#allocation3], %s1129_s22  ;;  %s1124_s14 = sshll.u32 %s2338_s19, 3  ;;  %v1384_v13 = vld [vmem:[%s1942_s23 + $0xc] ss:$0 sps:$4 sm:$0xff]  }
  0xa6   : > { %s348_s20 = sshra.s32 %s1124_s14, 3  ;;  %v1385_v14 = vld [vmem:[%s366_s26] ss:$0 sps:$4 sm:$0xff]   ;;  %s1953_s13 = scalar_lea.vmem [#allocation11], %s1933_s18 }
  0xa7   : > { %1189 = vmatpush3.bf16.msra.mxu0 %v1376_v3  ;;  %s1125_s10 = sshll.u32 %s348_s20, 2  ;;  %v390_v15 = vsel %vm383_vm1, %v1384_v13, %v1385_v14  ;;  %p1143_p10 = scmp.ne.s32.totalorder %s1630_s30, 0 }
  0xa8   : > { %1190 = vmatprep.subr.bf16.mxu0 %v1656_v0  ;;  %s351_s27 = scalar_lea.vmem [#allocation3], %s1125_s10  ;;  %v1658_v41 = vmov (!%p1143_p10), 0.0  }
  0xa9   : > { %v352_v10 = vld [vmem:[%s351_s27] sm:$0xf] }
  0xaa   : > { %v386_v11 = vsel %vm383_vm1, %v352_v10, %v1382_v9 }
  0xab   : > { %1191 = vmatpush3.bf16.msra.mxu0 %v1377_v4 }
  0xac   : > { %1192 = vmatprep.subr.bf16.mxu0 %v1656_v0 }
  0xaf   : > { %1193 = vmatpush3.bf16.msra.mxu0 %v1378_v5 }
  0xb0   : > { %1194 = vmatprep.subr.bf16.mxu0 %v1656_v0 }
  0xb3   : > { %1195 = vmatpush3.bf16.msra.mxu0 %v1379_v6 }
  0xb4   : > { %1196 = vmatprep.subr.bf16.mxu0 %v1656_v0 }
  0xb7   : > { %1197 = vmatpush3.bf16.msra.mxu0 %v1380_v7 }
  0xb8   : > { %1198 = vmatprep.subr.bf16.mxu0 %v1656_v0 }
  0xbb   : > { %1199 = vmatpush3.bf16.msra.mxu0 %v1381_v8 }
  0xbe   : > { %1201 = vmatmul.mubr.bf16.vlgmr.msra.gmra.mrb[0].mxu0 %v386_v11 }
  0xbf   : > { %1204 = vmatprep.mubr.msk.bf16.mxu0 %vm1657_vm0, %v1656_v0 }
  0xc6   : > { %1205 = vmatmul.mubr.bf16.gmra.mrb[4].mxu0 %v1383_v12 }
  0xc7   : > { %1208 = vmatprep.mubr.msk.bf16.mxu0 %vm1657_vm0, %v1656_v0 }
  0xce   : > { %1209 = vmatmul.mubr.bf16.gmra.mrb[8].mxu0 %v390_v15 }
 0x191   : > { %v497_v17 = vpop.f32.mrb[0].mxu0 }
 0x192   : > { %v498_v18 = vadd.f32 %v1134_v16, %v497_v17  ;;  %v1202_v19 = vpop.f32.mrb[1].mxu0 }
 0x193   : > { %v500_v20 = vpop.f32.mrb[2].mxu0 }
 0x194   : > { %v520_v21 = vmax.f32 %v498_v18, 0.0  ;;  %v501_v22 = vadd.f32 %v1134_v16, %v500_v20  ;;  %v1203_v23 = vpop.f32.mrb[3].mxu0 }
 0x196   : > { %526 = vst [vmem:[#allocation2] sm:$0xff] %v520_v21  ;;  %v521_v24 = vmax.f32 %v501_v22, 0.0 }
 0x197   : > { %536 = vst [vmem:[#allocation2] sm:$0xff] (!%p1143_p10), %v1658_v41 }
 0x198   : > { %527 = vst [vmem:[#allocation2 + $0x8] sm:$0xff] %v521_v24 }
 0x199   : > { %v505_v25 = vpop.f32.mrb[4].mxu0 }
 0x19a   : > { %v506_v26 = vadd.f32 %v1134_v16, %v505_v25  ;;  %v1206_v27 = vpop.f32.mrb[5].mxu0 }
 0x19b   : > { %v508_v28 = vpop.f32.mrb[6].mxu0 }
 0x19c   : > { %v522_v29 = vmax.f32 %v506_v26, 0.0  ;;  %v509_v30 = vadd.f32 %v1134_v16, %v508_v28  ;;  %v1207_v31 = vpop.f32.mrb[7].mxu0 }
 0x19e   : > { %528 = vst [vmem:[#allocation2 + $0x10] sm:$0xff] %v522_v29  ;;  %v523_v32 = vmax.f32 %v509_v30, 0.0 }
 0x1a0   : > { %529 = vst [vmem:[#allocation2 + $0x18] sm:$0xff] %v523_v32 }
 0x1a1   : > { %v513_v33 = vpop.f32.mrb[8].mxu0 }
 0x1a2   : > { %v514_v34 = vadd.f32 %v1134_v16, %v513_v33  ;;  %v1210_v35 = vpop.f32.mrb[9].mxu0  ;;  %535 = sbr.rel (%p1143_p10) target bundleno = 425 (0x1a9), region = 68 }
 0x1a3   : > { %v516_v36 = vpop.f32.mrb[10].mxu0 }
 0x1a4   : > { %v524_v37 = vmax.f32 %v514_v34, 0.0  ;;  %v517_v38 = vadd.f32 %v1134_v16, %v516_v36  ;;  %v1211_v39 = vpop.f32.mrb[11].mxu0 }
 0x1a6   : > { %530 = vst [vmem:[#allocation2 + $0x20] sm:$0xff] %v524_v37  ;;  %v525_v40 = vmax.f32 %v517_v38, 0.0 }
 0x1a8   : > { %531 = vst [vmem:[#allocation2 + $0x28] sm:$0xff] %v525_v40 }
 0x1a9 PF: > { %p1144_p11 = scmp.ne.s32.totalorder %s1630_s30, 1 }
 0x1aa   : > { %v1659_v42 = vmov (!%p1144_p11), 0.0  }
 0x1ab   : > { %540 = sbr.rel (%p1144_p11) target bundleno = 434 (0x1b2), region = 72  ;;  %541 = vst [vmem:[#allocation2 + $0x28] sm:$0xff] (!%p1144_p11), %v1659_v42 }
 0x1b2 PF: > { %v1386_v43 = vld [vmem:[#allocation9] sm:$0xff]   ;;  %v548_v44 = vlaneseq  ;;  %v1387_v45 = vld [vmem:[#allocation9 + $0x8] sm:$0xff]   ;;  %v1388_v47 = vld [vmem:[#allocation9 + $0x10] sm:$0xff]   ;;  %s1158_s17 = sshll.u32 %s1634_s8, 3  ;;  %s996_s12 = sshll.u32 %s1953_s13, 4  ;;  %s2166_s12 = int_to_ptr.vmem [resolvable:$true] %s996_s12 }
 0x1b3   : > { %1212 = vmatprep.subr.bf16.mxu1 %v1386_v43  ;;  %v1389_v51 = vld [vmem:[#allocation9 + $0x18] sm:$0xff]   ;;  %v1963_v53 = vld [vmem:[#allocation2] sm:$0xff]  ;;  %v1965_v54 = vld [vmem:[#allocation2 + $0x8] sm:$0xff]  ;;  %s993_s24 = sadd.s32 %s1158_s17, %s1937_s16  ;;  %s2173_s22 = scalar_lea.sflag [#allocation5], %s335_s9 }
 0x1b4   : > { %v1957_v46 = vshrl.u32 %v548_v44, 7  ;;  %1213 = vmatpush3.bf16.msra.mxu1 %v1386_v43  ;;  %v1967_v55 = vld [vmem:[#allocation2 + $0x10] sm:$0xff]  ;;  %v1969_v59 = vld [vmem:[#allocation2 + $0x18] sm:$0xff]  ;;  %v1971_v60 = vld [vmem:[#allocation2 + $0x28] sm:$0xff]  ;;  %v633_v61 = vrot.slane %v1963_v53, 7  ;;  %v634_v62 = vrot.slane %v1965_v54, 7 }
 0x1b5   : > { %1214 = vmatprep.subr.bf16.mxu1 %v1387_v45  ;;  %v635_v2 = vrot.slane %v1967_v55, 7  ;;  %v636_v4 = vrot.slane %v1969_v59, 7  ;;  %v638_v5 = vrot.slane %v1971_v60, 7  ;;  %v1390_v6 = vld [vmem:[#allocation9 + $0x20] sm:$0xff]   ;;  %v670_v19 = vrot.slane %v1963_v53, 1  ;;  %v1391_v24 = vld [vmem:[#allocation9 + $0x28] sm:$0xff]  }
 0x1b6   : > { %v550_v48 = vadd.s32 8, %v1957_v46  ;;  %v551_v49 = vadd.s32 16, %v1957_v46  ;;  %v552_v50 = vadd.s32 24, %v1957_v46  ;;  %v559_v52 = vand.u32 7, %v1957_v46  ;;  %v1995_v7 = vld [vmem:[#allocation2 + $0x20] sm:$0xff]  ;;  %v2041_v25 = vld [vmem:[#allocation8] sm:$0xff] }
 0x1b7   : > { %vm639_vm6 = vcmp.lt.s32.totalorder %v1957_v46, 1  ;;  %v671_v20 = vrot.slane %v1965_v54, 1  ;;  %v672_v21 = vrot.slane %v1967_v55, 1  ;;  %v673_v22 = vrot.slane %v1969_v59, 1  ;;  %v1392_v37 = vld [vmem:[#allocation9 + $0x30] sm:$0xff]   ;;  %v1393_v1 = vld [vmem:[#allocation9 + $0x38] sm:$0xff]  }
 0x1b8   : > { %1215 = vmatpush3.bf16.msra.mxu1 %v1387_v45  ;;  %v566_v56 = vand.u32 7, %v550_v48  ;;  %v573_v57 = vand.u32 7, %v551_v49  ;;  %v580_v58 = vand.u32 7, %v552_v50  ;;  %vm1975_vm2 = vcmp.ge.s32.totalorder %v559_v52, 1  ;;  %v1145_v42 = vld [vmem:[%s2238_s4] ss:$0 sm:$0xff] }
 0x1b9   : > { %1216 = vmatprep.subr.bf16.mxu1 %v1388_v47  ;;  %v643_v8 = vsel %vm639_vm6, %v634_v62, %v635_v2  ;;  %v644_v9 = vsel %vm639_vm6, %v633_v61, %v634_v62  ;;  %vm2001_vm7 = vcmp.le.s32.totalorder %v559_v52, 6  ;;  %v642_v12 = vsel %vm639_vm6, %v635_v2, %v636_v4  ;;  %s1159_s15 = sshll.u32 %s993_s24, 7  ;;  %s1516_s26 = scalar_lea.vmem %s2166_s12, 512 }
 0x1ba   : > { %vm1979_vm3 = vcmp.ge.s32.totalorder %v566_v56, 1  ;;  %vm1983_vm4 = vcmp.ge.s32.totalorder %v573_v57, 1  ;;  %vm1988_vm5 = vcmp.ge.s32.totalorder %v580_v58, 1  ;;  %vm2005_vm8 = vcmp.le.s32.totalorder %v566_v56, 6  ;;  %s2164_s23 = scalar_lea.hbm %s2241_s7, %s1159_s15  ;;  %p1517_p3 = scmp.ne.s32.totalorder %s2166_s12, %s1516_s26 }
 0x1bb   : > { %v645_v13 = vsel %vm639_vm6, %v638_v5, %v633_v61  ;;  %v2019_v14 = vsel %vm1979_vm3, %v644_v9, 0.0  ;;  %vm2021_vm9 = vcmp.le.s32.totalorder %v573_v57, 6  ;;  %v2029_v17 = vsel %vm1983_vm4, %v643_v8, 0.0  ;;  %p2313_p13 = scmp.ne.s32.totalorder %s2275_s21, 0  ;;  %s1660_s14 = smov [#allocation11]  }
 0x1bc   : > { %1217 = vmatpush3.bf16.msra.mxu1 %v1388_v47  ;;  %v658_v16 = vsel %vm1975_vm2, %v645_v13, 0.0  ;;  %vm2031_vm10 = vcmp.le.s32.totalorder %v580_v58, 6  ;;  %v674_v23 = vrot.slane %v1995_v7, 1  ;;  %vm676_vm11 = vcmp.lt.s32.totalorder %v1957_v46, 7  ;;  %s1520_s20 = sshll.u32 %s1660_s14, 4  ;;  %s1521_s20 = int_to_ptr.vmem [resolvable:$false] %s1520_s20 }
 0x1bd   : > { %1218 = vmatprep.subr.bf16.mxu1 %v1389_v51  ;;  %v712_v26 = vsub.s32 0, %v1957_v46  ;;  %v724_v27 = vsub.s32 1, %v1957_v46  ;;  %v736_v28 = vsub.s32 2, %v1957_v46  ;;  %v679_v30 = vsel %vm676_vm11, %v672_v21, %v673_v22  ;;  %p1518_p0 = pnand %p1517_p3, %p2313_p13  ;;  %s1522_s10 = scalar_lea.vmem %s1521_s20, 1024 }
 0x1be   : > { %v678_v29 = vsel %vm676_vm11, %v673_v22, %v674_v23  ;;  %v680_v31 = vsel %vm676_vm11, %v671_v20, %v672_v21  ;;  %v681_v32 = vsel %vm676_vm11, %v670_v19, %v671_v20  ;;  %v2060_v33 = vsel %vm1988_vm5, %v642_v12, 0.0  ;;  %p1523_p2 = scmp.lt.s32.totalorder %s2166_s12, %s1521_s20  ;;  %p1524_p12 = scmp.lt.s32.totalorder %s1522_s10, %s1516_s26 }
 0x1bf   : > { %v695_v34 = vsel %vm2001_vm7, %v681_v32, 0.0  ;;  %v696_v35 = vsel %vm2005_vm8, %v680_v31, 0.0  ;;  %v2068_v36 = vsel %vm2021_vm9, %v679_v30, 0.0  ;;  %v2072_v38 = vsel %vm2031_vm10, %v678_v29, 0.0  ;;  %p1519_p4 = pneg %p1518_p0 }
 0x1c0   : > { %1219 = vmatpush3.bf16.msra.mxu1 %v1389_v51  ;;  %v713_v39 = vrot.slane %v2041_v25, %v712_v26  ;;  %v725_v40 = vrot.slane %v2041_v25, %v724_v27  ;;  %v737_v41 = vrot.slane %v2041_v25, %v736_v28  ;;  %v748_v43 = vsub.s32 3, %v1957_v46  ;;  %p1525_p5 = por %p1524_p12, %p1523_p2 }
 0x1c1   : > { %1220 = vmatprep.subr.bf16.mxu1 %v1390_v6  ;;  %v760_v44 = vsub.s32 4, %v1957_v46  ;;  %v772_v45 = vsub.s32 5, %v1957_v46  ;;  %v784_v47 = vsub.s32 6, %v1957_v46  ;;  %v796_v8 = vsub.s32 7, %v1957_v46 }
 0x1c2   : > { %v714_v48 = vmul.f32 %v713_v39, %v658_v16  ;;  %v715_v49 = vmul.f32 %v713_v39, %v2019_v14  ;;  %v716_v50 = vmul.f32 %v713_v39, %v2029_v17  ;;  %v717_v51 = vmul.f32 %v713_v39, %v2060_v33  ;;  %p1526_p6 = pnand %p1525_p5, %p1519_p4 }
 0x1c3   : > { %v726_v52 = vmul.f32 %v725_v40, %v1963_v53  ;;  %v727_v56 = vmul.f32 %v725_v40, %v1965_v54  ;;  %v728_v57 = vmul.f32 %v725_v40, %v1967_v55  ;;  %v729_v58 = vmul.f32 %v725_v40, %v1969_v59 }
 0x1c4   : > { %1221 = vmatpush3.bf16.msra.mxu1 %v1390_v6  ;;  %v718_v61 = vadd.f32 %v1145_v42, %v714_v48  ;;  %v719_v62 = vadd.f32 %v1145_v42, %v715_v49  ;;  %v720_v63 = vadd.f32 %v1145_v42, %v716_v50  ;;  %v721_v0 = vadd.f32 %v1145_v42, %v717_v51 }
 0x1c5   : > { %1222 = vmatprep.subr.bf16.mxu1 %v1391_v24  ;;  %v738_v2 = vmul.f32 %v737_v41, %v695_v34  ;;  %v739_v3 = vmul.f32 %v737_v41, %v696_v35  ;;  %v740_v6 = vmul.f32 %v737_v41, %v2068_v36  ;;  %v741_v12 = vmul.f32 %v737_v41, %v2072_v38  ;;  %v2104_v34 = vld [vmem:[#allocation8 + $0x8] ss:$0 sm:$0xff] }
 0x1c6   : > { %v730_v9 = vadd.f32 %v726_v52, %v718_v61  ;;  %v731_v10 = vadd.f32 %v727_v56, %v719_v62  ;;  %v732_v11 = vadd.f32 %v728_v57, %v720_v63  ;;  %v733_v13 = vadd.f32 %v729_v58, %v721_v0 }
 0x1c7   : > { %v749_v15 = vrot.slane %v2041_v25, %v748_v43  ;;  %v761_v16 = vrot.slane %v2041_v25, %v760_v44  ;;  %v773_v18 = vrot.slane %v2041_v25, %v772_v45  ;;  %v810_v49 = vmul.f32 %v2104_v34, %v2068_v36 }
 0x1c8   : > { %1223 = vmatpush3.bf16.msra.mxu1 %v1391_v24  ;;  %v742_v20 = vadd.f32 %v738_v2, %v730_v9  ;;  %v743_v21 = vadd.f32 %v739_v3, %v731_v10  ;;  %v744_v22 = vadd.f32 %v740_v6, %v732_v11  ;;  %v785_v24 = vrot.slane %v2041_v25, %v784_v47 }
 0x1c9   : > { %1224 = vmatprep.subr.bf16.mxu1 %v1392_v37  ;;  %v750_v26 = vmul.f32 %v749_v15, %v2019_v14  ;;  %v751_v27 = vmul.f32 %v749_v15, %v2029_v17  ;;  %v752_v28 = vmul.f32 %v749_v15, %v2060_v33  ;;  %v762_v29 = vmul.f32 %v761_v16, %v1965_v54 }
 0x1ca   : > { %v763_v30 = vmul.f32 %v761_v16, %v1967_v55  ;;  %v764_v31 = vmul.f32 %v761_v16, %v1969_v59  ;;  %v774_v32 = vmul.f32 %v773_v18, %v696_v35  ;;  %v775_v41 = vmul.f32 %v773_v18, %v2068_v36 }
 0x1cb   : > { %v755_v39 = vadd.f32 %v751_v27, %v743_v21  ;;  %v756_v40 = vadd.f32 %v752_v28, %v744_v22  ;;  %v745_v14 = vadd.f32 %v741_v12, %v733_v13  ;;  %v776_v42 = vmul.f32 %v773_v18, %v2072_v38 }
 0x1cc   : > { %1225 = vmatpush3.bf16.msra.mxu1 %v1392_v37  ;;  %v754_v37 = vadd.f32 %v750_v26, %v742_v20  ;;  %v786_v43 = vmul.f32 %v785_v24, %v2029_v17  ;;  %v797_v54 = vrot.slane %v2041_v25, %v796_v8  ;;  %v787_v35 = vmul.f32 %v785_v24, %v2060_v33 }
 0x1cd   : > { %1226 = vmatprep.subr.bf16.mxu1 %v1393_v1  ;;  %v767_v45 = vadd.f32 %v763_v30, %v755_v39  ;;  %v768_v47 = vadd.f32 %v764_v31, %v756_v40  ;;  %v553_v50 = vadd.s32 32, %v1957_v46  ;;  %v554_v51 = vadd.s32 40, %v1957_v46 }
 0x1ce   : > { %v766_v44 = vadd.f32 %v762_v29, %v754_v37  ;;  %v798_v48 = vmul.f32 %v797_v54, %v1967_v55  ;;  %v799_v17 = vmul.f32 %v797_v54, %v1969_v59  ;;  %v637_v25 = vrot.slane %v1995_v7, 7 }
 0x1cf   : > { %v779_v56 = vadd.f32 %v775_v41, %v767_v45  ;;  %v811_v57 = vmul.f32 %v2104_v34, %v2072_v38  ;;  %v587_v58 = vand.u32 7, %v553_v50  ;;  %v594_v33 = vand.u32 7, %v554_v51 }
 0x1d0   : > { %1227 = vmatpush3.bf16.msra.mxu1 %v1393_v1  ;;  %v778_v52 = vadd.f32 %v774_v32, %v766_v44  ;;  %v675_v55 = vrot.slane %v1971_v60, 1  ;;  %v780_v61 = vadd.f32 %v776_v42, %v768_v47  ;;  %v641_v63 = vsel %vm639_vm6, %v636_v4, %v637_v25 }
 0x1d1   : > { %v791_v36 = vadd.f32 %v787_v35, %v779_v56  ;;  %vm631_vm12 = vcmp.ge.s32.totalorder %v587_v58, 1  ;;  %vm2125_vm13 = vcmp.ge.s32.totalorder %v594_v33, 1  ;;  %v640_v38 = vsel %vm639_vm6, %v637_v25, %v638_v5 }
 0x1d2   : > { %v790_v62 = vadd.f32 %v786_v43, %v778_v52  ;;  %vm668_vm14 = vcmp.le.s32.totalorder %v587_v58, 6  ;;  %v662_v3 = vsel %vm631_vm12, %v641_v63, 0.0  ;;  %v765_v6 = vmul.f32 %v761_v16, %v1995_v7 }
 0x1d3   : > { %v803_v2 = vadd.f32 %v799_v17, %v791_v36  ;;  %vm2134_vm15 = vcmp.le.s32.totalorder %v594_v33, 6  ;;  %v677_v4 = vsel %vm676_vm11, %v674_v23, %v675_v55  ;;  %v753_v8 = vmul.f32 %v749_v15, %v662_v3 }
 0x1d4   : > { %v802_v1 = vadd.f32 %v798_v48, %v790_v62  ;;  %v788_v9 = vmul.f32 %v785_v24, %v662_v3  ;;  %v663_v5 = vsel %vm2125_vm13, %v640_v38, 0.0  ;;  %v699_v12 = vsel %vm668_vm14, %v677_v4, 0.0 }
 0x1d5   : > { %v815_v11 = vadd.f32 %v811_v57, %v803_v2  ;;  %v682_v13 = vsel %vm676_vm11, %v675_v55, %v670_v19  ;;  %v757_v16 = vadd.f32 %v753_v8, %v745_v14  ;;  %v777_v20 = vmul.f32 %v773_v18, %v699_v12 }
 0x1d6   : > { %v814_v10 = vadd.f32 %v810_v49, %v802_v1  ;;  %v792_v21 = vadd.f32 %v788_v9, %v780_v61  ;;  %v789_v23 = vmul.f32 %v785_v24, %v663_v5  ;;  %v800_v15 = vmul.f32 %v797_v54, %v1995_v7 }
 0x1d7   : > { %v819_v26 = vmul.f32 %v815_v11, %v815_v11  ;;  %v769_v27 = vadd.f32 %v765_v6, %v757_v16  ;;  %v812_v28 = vmul.f32 %v2104_v34, %v699_v12  ;;  %v700_v31 = vsel %vm2134_vm15, %v682_v13, 0.0  ;;  %v1147_v6 = vld [vmem:[%s2240_s6] ss:$0 sm:$0xff] }
 0x1d8   : > { %v818_v22 = vmul.f32 %v814_v10, %v814_v10  ;;  %v801_v46 = vmul.f32 %v797_v54, %v1971_v60  ;;  %v804_v19 = vadd.f32 %v800_v15, %v792_v21  ;;  %v813_v39 = vmul.f32 %v2104_v34, %v700_v31 }
 0x1d9   : > { %v823_v30 = vmul.f32 %v819_v26, %v815_v11  ;;  %v781_v53 = vadd.f32 %v777_v20, %v769_v27  ;;  %v834_v34 = vmul.f32 0.5, %v814_v10  ;;  %v835_v56 = vmul.f32 0.5, %v815_v11 }
 0x1da   : > { %v822_v29 = vmul.f32 %v818_v22, %v814_v10  ;;  %v816_v40 = vadd.f32 %v812_v28, %v804_v19 }
 0x1db   : > { %v827_v18 = vmul.f32 0.044715, %v823_v30  ;;  %v793_v37 = vadd.f32 %v789_v23, %v781_v53 }
 0x1dc   : > { %v826_v32 = vmul.f32 0.044715, %v822_v29  ;;  %v820_v14 = vmul.f32 %v816_v40, %v816_v40  ;;  %v836_v62 = vmul.f32 0.5, %v816_v40 }
 0x1dd   : > { %v831_v41 = vadd.f32 %v827_v18, %v815_v11  ;;  %v805_v7 = vadd.f32 %v801_v46, %v793_v37 }
 0x1de   : > { %v830_v24 = vadd.f32 %v826_v32, %v814_v10  ;;  %v824_v45 = vmul.f32 %v820_v14, %v816_v40 }
 0x1df   : > { %v839_v43 = vmul.f32 0.7978846, %v831_v41  ;;  %v817_v44 = vadd.f32 %v813_v39, %v805_v7 }
 0x1e0   : > { %v838_v42 = vmul.f32 0.7978846, %v830_v24  ;;  %v828_v35 = vmul.f32 0.044715, %v824_v45 }
 0x1e1   : > { %v821_v47 = vmul.f32 %v817_v44, %v817_v44  ;;  %v837_v63 = vmul.f32 0.5, %v817_v44 }
 0x1e2   : > { %1394 = vtanh.f32 %v838_v42  ;;  %v832_v54 = vadd.f32 %v828_v35, %v816_v40 }
 0x1e3   : > { %1396 = vtanh.f32 %v839_v43  ;;  %v825_v60 = vmul.f32 %v821_v47, %v817_v44 }
 0x1e4   : > { %v840_v49 = vmul.f32 0.7978846, %v832_v54 }
 0x1e5   : > { %v829_v48 = vmul.f32 0.044715, %v825_v60 }
 0x1e6   : > { %1398 = vtanh.f32 %v840_v49 }
 0x1e7   : > { %v833_v50 = vadd.f32 %v829_v48, %v817_v44 }
 0x1e9   : > { %v841_v51 = vmul.f32 0.7978846, %v833_v50 }
 0x1eb   : > { %1400 = vtanh.f32 %v841_v51 }
 0x1ec   : > { %v1395_v52 = vpop.eup %1394 }
 0x1ed   : > { %v1397_v17 = vpop.eup %1396  ;;  %v846_v25 = vadd.f32 1.0, %v1395_v52 }
 0x1ee   : > { %v847_v57 = vadd.f32 1.0, %v1397_v17 }
 0x1ef   : > { %v850_v58 = vmul.f32 %v846_v25, %v834_v34 }
 0x1f0   : > { %v851_v33 = vmul.f32 %v847_v57, %v835_v56  ;;  %v1399_v61 = vpop.eup %1398 }
 0x1f1   : > { %v848_v36 = vadd.f32 1.0, %v1399_v61 }
 0x1f2   : > { %v854_v55 = vpack.c.bf16 %v851_v33, %v850_v58 }
 0x1f3   : > { %v852_v1 = vmul.f32 %v848_v36, %v836_v62 }
 0x1f4   : > { %1228 = vmatprep.mubr.bf16.mxu1 %v854_v55 }
 0x1f5   : > { %v1401_v0 = vpop.eup %1400 }
 0x1f6   : > { %v849_v38 = vadd.f32 1.0, %v1401_v0 }
 0x1f8   : > { %v853_v2 = vmul.f32 %v849_v38, %v837_v63 }
 0x1fa   : > { %v855_v3 = vpack.c.bf16 %v853_v2, %v852_v1 }
 0x1fc   : > { %1229 = vmatmul.mubr.bf16.vlgmr.msra.gmra.mrb[0].mxu1 %v855_v3 }
 0x2cf   : > { %v1230_v59 = vpop.f32.mrb[0].mxu1 }
 0x2d0   : > { %v970_v4 = vadd.f32 %v1230_v59, %v1147_v6  ;;  %v961_v8 = vpop.f32.mrb[1].mxu1 }
 0x2d1   : > { %v962_v9 = vadd.f32 %v1147_v6, %v961_v8  ;;  %v1231_v10 = vpop.f32.mrb[2].mxu1 }
 0x2d2   : > { %978 = vst [vmem:[%s1953_s13 + $0x10] sm:$0xff] %v970_v4  ;;  %v973_v11 = vadd.f32 %v1231_v10, %v1147_v6  ;;  %v964_v5 = vpop.f32.mrb[3].mxu1 }
 0x2d3   : > { %976 = vst [vmem:[%s1953_s13] sm:$0xff] %v962_v9  ;;  %v965_v12 = vadd.f32 %v1147_v6, %v964_v5 }
 0x2d4   : > { %979 = vst [vmem:[%s1953_s13 + $0x18] sm:$0xff] %v973_v11 }
 0x2d5   : > { %977 = vst [vmem:[%s1953_s13 + $0x8] sm:$0xff] %v965_v12 }
 0x2d6   : > { %1529 = shalt.err (!%p1526_p6)
}
 0x2d7   : > { %s1530_s9 = scalar_lea.hbm %s2164_s23, 512  ;;  %s1534_s28 = scalar_lea.hbm %s2241_s7, 2048 }
 0x2d8   : > { %p1531_p9 = scmp.ne.s32.totalorder %s2164_s23, %s1530_s9  ;;  %p1535_p1 = scmp.lt.u32.totalorder %s2164_s23, %s2241_s7 }
 0x2d9   : > { %p1536_p10 = scmp.lt.u32.totalorder %s1534_s28, %s1530_s9  ;;  %p1538_p3 = scmp.lt.u32.totalorder %s1530_s9, %s2164_s23 }
 0x2da   : > { %p1532_p7 = pnand %p1531_p9, %p2313_p13 }
 0x2db   : > { %p1537_p11 = por %p1536_p10, %p1535_p1 }
 0x2dc   : > { %p1533_p8 = pneg %p1532_p7 }
 0x2dd   : > { %p1539_p0 = por %p1538_p3, %p1537_p11 }
 0x2df   : > { %p1540_p4 = pnand %p1539_p0, %p1533_p8 }
 0x2e1   : > { %1543 = shalt.err (!%p1540_p4)
}
 0x2e2   : > { %s1661_s18 = smov 128   ;;  %s1662_s17 = smov 8  }
 0x2e3   : > { %1246 = dma.vmem_to_hbm [thread:$0]  (%p2313_p13), %s2166_s12, 512, %s2164_s23, %s2173_s22, %s1661_s18, %s1661_s18, %s1662_s17  }
 0x2e4 PF: > { %s2314_s24 = sld [smem:[#allocation16_spill]]  ;;  %s2315_s19 = sld [smem:[#allocation24_spill]] }
 0x2e5   : > { %p1271_p2 = scmp.ge.s32.totalorder %s1646_s11, 2 }
 0x2ea   : > { %s1011_s29 = sand.u32 1, %s2314_s24   ;;  %p2316_p12 = scmp.ne.s32.totalorder %s2315_s19, 0 }
 0x2eb   : > { %s1012_s15 = scalar_lea.sflag [#allocation5], %s1011_s29 }
 0x2ec   : > { %p1262_p5 = pnand %p1271_p2, %p2316_p12 }
 0x2ee   : > { %1601 = dma.done.wait (!%p1262_p5), %s1012_s15, 512  }
 0x2ef   : > { %1603 = vsyncadd (!%p1262_p5), %s1012_s15, 4294966784  ;;  %s23_s11 = sadd.s32 1, %s1646_s11   ;;  %s2317_s8 = sld [smem:[#allocation17_spill]] }
 0x2f0   : > { %p20_p6 = scmp.ge.s32.totalorder %s23_s11, 6   ;;  %s2318_s26 = sld [smem:[#allocation26_spill]] }
 0x2f1   : > { %s2319_s27 = sld [smem:[#allocation18_spill]]  ;;  %s2320_s28 = sld [smem:[#allocation19_spill]] }
 0x2f2   : > { %s2321_s29 = sld [smem:[#allocation25_spill]]  ;;  %s2322_s30 = sld [smem:[#allocation20_spill]] }
 0x2f3   : > { %s2323_s21 = sld [smem:[#allocation21_spill]]  ;;  %s2324_s9 = sld [smem:[#allocation22_spill]] }
 0x2f4   : > { %s2325_s10 = sld [smem:[#allocation23_spill]]  ;;  %s2326_s24 = smov %s1610_s25 }
 0x2f5   : > { %s2327_s25 = smov %s2317_s8  ;;  %22 = sbr.rel (!%p20_p6) target bundleno = 12 (0xc), region = 109 }
 0x2f9   : > { %s2328_s8 = smov %s2323_s21 }
 0x2fc   :  { %1017 = vsyncpa [#allocation4], 1 }
 0x2fd   :  { %1019 = vsyncpa [#allocation4 + $0x1], 1 }
 0x2fe   :  { %1020 = vsyncpa [#allocation7], 1 }
 0x2ff   :  { %1021 = vsyncpa [#allocation10], 1 }
 0x300   :  { %1022 = vsyncpa [#allocation5], 1 }
 0x301   :  { %1024 = vsyncpa [#allocation5 + $0x1], 1 }

// kernel: tpu_custom_call.1
= control target key start
LH: loop header
LB: loop body
LE: loop exit
PB: predicated region body
PF: predicated region fallthrough
CT: control target
= control target key end

     0   :  { %s2302_s0 = inlined_call_operand.hbm [shape: bf16[2,64,128], index: 0, kind: input, shape index: {}]   ;;  %s2303_s1 = inlined_call_operand.hbm [shape: bf16[128,128], index: 1, kind: input, shape index: {}]   ;;  %s2304_s2 = inlined_call_operand.vmem [shape: f32[1,128], index: 2, kind: input, shape index: {}]   ;;  %s2305_s3 = inlined_call_operand.hbm [shape: f32[9,128], index: 3, kind: input, shape index: {}]   ;;  %s2306_s4 = inlined_call_operand.vmem [shape: f32[1,128], index: 4, kind: input, shape index: {}]   ;;  %s2307_s5 = inlined_call_operand.hbm [shape: bf16[128,128], index: 5, kind: input, shape index: {}]   ;;  %s2308_s6 = inlined_call_operand.vmem [shape: f32[1,128], index: 6, kind: input, shape index: {}]   ;;  %s2309_s7 = inlined_call_operand.hbm [shape: f32[2,64,128], index: 7, kind: output, shape index: {}]  }
   0x1   :  { %2326 = sst [smem:[#allocation22_spill]] %s2303_s1 }
   0x2   :  { %2327 = sst [smem:[#allocation23_spill]] %s2305_s3 }
   0x3   :  { %2328 = sst [smem:[#allocation24_spill]] %s2306_s4 }
   0x4   :  { %2329 = sst [smem:[#allocation25_spill]] %s2307_s5 }
   0x5   :  { %2330 = sst [smem:[#allocation26_spill]] %s2308_s6 }
   0x6   :  { %2331 = sst [smem:[#allocation27_spill]] %s2309_s7 }
   0x7   :  { %12 = vsyncpa [#allocation4], 0 }
   0x8   :  { %14 = vsyncpa [#allocation4 + $0x1], 0 }
   0x9   :  { %15 = vsyncpa [#allocation7], 0 }
   0xa   :  { %16 = vsyncpa [#allocation10], 0 }
   0xb   :  { %17 = vsyncpa [#allocation5], 0 }
   0xc   :  { %19 = vsyncpa [#allocation5 + $0x1], 0  ;;  %s1733_s24 = smov 0   ;;  %s1735_s25 = smov 0  }
   0xd   :  { %s1737_s26 = smov 0   ;;  %s1739_s27 = smov 0  }
   0xe   :  { %s1741_s28 = smov 0   ;;  %s1743_s29 = smov 0  }
   0xf   :  { %s1745_s30 = smov 0   ;;  %s1747_s8 = smov 0  }
  0x10   :  { %s1749_s9 = smov 0   ;;  %s1751_s10 = smov 0  }
  0x11   :  { %s1753_s11 = smov 0  }
  0x12 LB: > { %2332 = sst [smem:[#allocation16_spill]] %s1636_s24  ;;  %s1135_s12 = sadd.s32 4294967295, %s1676_s11   ;;  %s1676_s11 = sphi %s1753_s11, %s25_s11   ;;  %s1672_s10 = sphi %s1751_s10, %s2396_s10   ;;  %s1668_s9 = sphi %s1749_s9, %s2395_s9   ;;  %s1664_s8 = sphi %s1747_s8, %s2394_s8   ;;  %s1660_s30 = sphi %s1745_s30, %s2393_s30   ;;  %s1656_s29 = sphi %s1743_s29, %s2392_s29   ;;  %s1652_s28 = sphi %s1741_s28, %s2391_s28   ;;  %s1648_s27 = sphi %s1739_s27, %s2390_s27   ;;  %s1644_s26 = sphi %s1737_s26, %s2389_s26   ;;  %s1640_s25 = sphi %s1735_s25, %s2388_s25   ;;  %s1636_s24 = sphi %s1733_s24, %s2387_s24  }
  0x13   : > { %2333 = sst [smem:[#allocation17_spill]] %s1664_s8  ;;  %s1136_s13 = sadd.s32 4294967294, %s1676_s11  }
  0x14   : > { %p57_p0 = scmp.ne.s32.totalorder %s1652_s28, %s1648_s27  ;;  %p1789_p1 = scmp.eq.s32.totalorder %s1135_s12, 0 }
  0x15   : > { %p208_p2 = scmp.ne.s32.totalorder %s1644_s26, %s1640_s25  ;;  %p209_p4 = scmp.eq.s32.totalorder %s1135_s12, 3 }
  0x16   : > { %s2334_s14 = scalar_select %p1789_p1, 1, 0 }
  0x17   : > { %p1798_p3 = por %p1789_p1, %p57_p0  ;;  %p214_p5 = scmp.ne.s32.totalorder %s1640_s25, %s1636_s24 }
  0x18   : > { %p215_p6 = scmp.eq.s32.totalorder %s1136_s13, 3  ;;  %p1804_p7 = por %p209_p4, %p208_p2 }
  0x19   : > { %s2335_s16 = scalar_select %p1798_p3, 1, 0 }
  0x1a   : > { %s2336_s17 = scalar_select %p1804_p7, 1, 0 }
  0x1b   : > { %p1137_p8 = scmp.ge.s32.totalorder %s1676_s11, 1  ;;  %p1809_p9 = por %p215_p6, %p214_p5 }
  0x1c   : > { %2337 = sst [smem:[#allocation18_spill]] %s2336_s17  ;;  %p222_p10 = scmp.lt.s32.totalorder %s1676_s11, 5 }
  0x1d   : > { %s2338_s18 = scalar_select %p1809_p9, 1, 0 }
  0x1e   : > { %p1814_p11 = pnand %p1137_p8, %p222_p10  ;;  %s1678_s20 = smov [#allocation6]  }
  0x1f   : > { %2339 = sst [smem:[#allocation19_spill]] %s2338_s18  ;;  %s234_s21 = sshll.u32 %s1678_s20, 4  ;;  %s235_s21 = int_to_ptr.vmem [resolvable:$true] %s234_s21 }
  0x20   : > { %s2340_s19 = scalar_select %p1814_p11, 1, 0 }
  0x21   : > { %p1277_p12 = pneg %p1814_p11  ;;  %s1679_s23 = smov [#allocation8]  }
  0x22   : > { %s250_s27 = sshll.u32 %s1679_s23, 4  ;;  %s2342_s1 = sld [smem:[#allocation22_spill]]  ;;  %s1826_s27 = int_to_ptr.vmem [resolvable:$true] %s250_s27 }
  0x23   : > { %p1822_p13 = pnand %p1277_p12, %p1789_p1 }
  0x25   : > { %p1836_p2 = pneg %p1822_p13 }
  0x28   : > { %s1432_s15 = scalar_lea.hbm %s2342_s1, 1024 }
  0x29   : > { %p1433_p0 = scmp.ne.s32.totalorder %s2342_s1, %s1432_s15  ;;  %p1439_p6 = scmp.lt.u32.totalorder %s1432_s15, %s2342_s1 }
  0x2b   : > { %p1435_p4 = pnand %p1836_p2, %p1433_p0 }
  0x2d   : > { %p1436_p5 = pneg %p1435_p4 }
  0x2f   : > { %p1441_p8 = pnand %p1439_p6, %p1436_p5 }
  0x31   : > { %1444 = shalt.err (!%p1441_p8)
}
  0x32   : > { %s1445_s12 = scalar_lea.vmem %s235_s21, 1024  ;;  %p1453_p7 = scmp.lt.s32.totalorder %s235_s21, %s235_s21 }
  0x33   : > { %p1446_p10 = scmp.ne.s32.totalorder %s235_s21, %s1445_s12  ;;  %p1454_p1 = scmp.lt.s32.totalorder %s1445_s12, %s1445_s12 }
  0x35   : > { %p1448_p12 = pnand %p1446_p10, %p1836_p2  ;;  %p1455_p3 = por %p1454_p1, %p1453_p7 }
  0x37   : > { %p1449_p9 = pneg %p1448_p12 }
  0x39   : > { %p1456_p11 = pnand %p1455_p3, %p1449_p9 }
  0x3b   : > { %1459 = shalt.err (!%p1456_p11)
}
  0x3c   : > { %s2320_s24 = smov 64   ;;  %s2322_s18 = smov 4  }
  0x3d   : > { %1280 = dma.hbm_to_vmem [thread:$0]  (!%p1822_p13), %s2342_s1, 1024, %s235_s21, [#allocation7], %s2320_s24, %s2320_s24, %s2322_s18  }
  0x3e   : > { %s2344_s3 = sld [smem:[#allocation23_spill]] }
  0x44   : > { %s1460_s17 = scalar_lea.hbm %s2344_s3, 256 }
  0x45   : > { %p1461_p1 = scmp.ne.s32.totalorder %s2344_s3, %s1460_s17  ;;  %p1467_p9 = scmp.lt.u32.totalorder %s1460_s17, %s2344_s3 }
  0x47   : > { %p1463_p3 = pnand %p1461_p1, %p1836_p2 }
  0x49   : > { %p1464_p7 = pneg %p1463_p3 }
  0x4b   : > { %p1469_p11 = pnand %p1467_p9, %p1464_p7 }
  0x4d   : > { %1472 = shalt.err (!%p1469_p11)
}
  0x4e   : > { %s1473_s21 = scalar_lea.vmem %s1826_s27, 256  ;;  %p1481_p6 = scmp.lt.s32.totalorder %s1826_s27, %s1826_s27 }
  0x4f   : > { %p1474_p0 = scmp.ne.s32.totalorder %s1826_s27, %s1473_s21  ;;  %p1482_p8 = scmp.lt.s32.totalorder %s1473_s21, %s1473_s21 }
  0x51   : > { %p1476_p4 = pnand %p1474_p0, %p1836_p2  ;;  %p1483_p10 = por %p1482_p8, %p1481_p6 }
  0x53   : > { %p1477_p5 = pneg %p1476_p4 }
  0x55   : > { %p1484_p12 = pnand %p1483_p10, %p1477_p5 }
  0x57   : > { %1487 = shalt.err (!%p1484_p12)
}
  0x58   : > { %s1682_s6 = smov 128   ;;  %s1683_s4 = smov 8  }
  0x59   : > { %1283 = dma.hbm_to_vmem [thread:$0]  (!%p1822_p13), %s2344_s3, 256, %s1826_s27, [#allocation7], %s1682_s6, %s1682_s6, %s1683_s4  }
  0x5a   : > { %s1684_s7 = smov [#allocation9]   ;;  %s2345_s5 = sld [smem:[#allocation25_spill]] }
  0x5b   : > { %s266_s15 = sshll.u32 %s1684_s7, 4  ;;  %s267_s15 = int_to_ptr.vmem [resolvable:$true] %s266_s15 }
  0x60   : > { %s1488_s12 = scalar_lea.hbm %s2345_s5, 1024 }
  0x61   : > { %p1489_p1 = scmp.ne.s32.totalorder %s2345_s5, %s1488_s12  ;;  %p1495_p9 = scmp.lt.u32.totalorder %s1488_s12, %s2345_s5 }
  0x63   : > { %p1491_p3 = pnand %p1489_p1, %p1836_p2 }
  0x65   : > { %p1492_p7 = pneg %p1491_p3 }
  0x67   : > { %p1497_p11 = pnand %p1495_p9, %p1492_p7 }
  0x69   : > { %1500 = shalt.err (!%p1497_p11)
}
  0x6a   : > { %s1501_s27 = scalar_lea.vmem %s267_s15, 1024  ;;  %p1509_p6 = scmp.lt.s32.totalorder %s267_s15, %s267_s15 }
  0x6b   : > { %p1502_p0 = scmp.ne.s32.totalorder %s267_s15, %s1501_s27  ;;  %p1510_p8 = scmp.lt.s32.totalorder %s1501_s27, %s1501_s27 }
  0x6d   : > { %p1504_p4 = pnand %p1502_p0, %p1836_p2  ;;  %p1511_p10 = por %p1510_p8, %p1509_p6 }
  0x6f   : > { %p1505_p5 = pneg %p1504_p4 }
  0x71   : > { %p1512_p12 = pnand %p1511_p10, %p1505_p5 }
  0x73   : > { %1515 = shalt.err (!%p1512_p12)
}
  0x74   : > { %s2346_s24 = smov 4   ;;  %s2347_s6 = smov 64  }
  0x75   : > { %1286 = dma.hbm_to_vmem [thread:$0]  (!%p1822_p13), %s2345_s5, 1024, %s267_s15, [#allocation10], %s2347_s6, %s2347_s6, %s2346_s24  }
  0x76   : > { %s34_s20 = sadd.s32 1, %s1668_s9  ;;  %s37_s22 = sadd.s32 1, %s1672_s10 }
  0x77   : > { %p35_p2 = scmp.ge.s32.totalorder %s34_s20, 2  ;;  %s44_s4 = sadd.s32 1, %s1656_s29 }
  0x78   : > { %p51_p1 = scmp.ne.s32.totalorder %s1656_s29, %s1652_s28  ;;  %p52_p3 = scmp.eq.s32.totalorder %s1676_s11, 0 }
  0x79   : > { %s2398_s20 = smov (%p35_p2, %s34_s20), 0  ;;  %s2400_s22 = smov (!%p35_p2, %s37_s22), %s1672_s10 }
  0x7a   : > { %2348 = sst [smem:[#allocation20_spill]] %s2398_s20  ;;  %s194_s8 = ssub.s32 %s1668_s9, %s2398_s20 }
  0x7b   : > { %p39_p7 = scmp.ge.s32.totalorder %s2400_s22, 2  ;;  %p1298_p9 = scmp.lt.s32.totalorder %s1676_s11, 4 }
  0x7c   : > { %p1911_p13 = por %p52_p3, %p51_p1  ;;  %s283_s7 = sand.u32 1, %s1656_s29  }
  0x7d   : > { %s2402_s22 = smov (%p39_p7, %s2400_s22), 0  ;;  %s1142_s15 = sshll.u32 %s283_s7, 5 }
  0x7e   : > { %2350 = sst [smem:[#allocation21_spill]] %s2402_s22  ;;  %s41_s13 = ssub.s32 %s1672_s10, %s2402_s22 }
  0x7f   : > { %p42_p11 = scmp.eq.s32.totalorder %s41_s13, 0  ;;  %s195_s23 = sor.u32 %s194_s8, %s41_s13 }
  0x80   : > { %p196_p0 = scmp.eq.s32.totalorder %s195_s23, 0  ;;  %s1191_s12 = sshll.u32 %s1672_s10, 9 }
  0x81   : > { %s1922_s21 = scalar_select %p42_p11, %s1656_s29, %s44_s4  }
  0x82   : > { %s2351_s27 = sadd.s32 1, %s1644_s26  ;;  %s1932_s5 = scalar_lea.hbm %s2302_s0, %s1191_s12 }
  0x83   : > { %s1927_s1 = scalar_select %p196_p0, %s1644_s26, %s2351_s27  }
  0x84   : > { %s287_s20 = scalar_lea.vmem [#allocation3], %s1142_s15  ;;  %p1940_p4 = pnand %p1298_p9, %p1911_p13 }
  0x85   : > { %s294_s22 = sshll.u32 %s287_s20, 4  ;;  %s1944_s8 = scalar_lea.sflag [#allocation4], %s283_s7  ;;  %s1934_s22 = int_to_ptr.vmem [resolvable:$true] %s294_s22 }
  0x86   : > { %s1516_s3 = scalar_lea.hbm %s1932_s5, 512  ;;  %p1518_p6 = pneg %p1940_p4 }
  0x87   : > { %p1517_p5 = scmp.ne.s32.totalorder %s1932_s5, %s1516_s3  ;;  %s1521_s17 = scalar_lea.hbm %s2302_s0, 1024 }
  0x88   : > { %p1522_p12 = scmp.lt.u32.totalorder %s1932_s5, %s2302_s0  ;;  %p1523_p2 = scmp.lt.u32.totalorder %s1521_s17, %s1516_s3 }
  0x89   : > { %p1519_p8 = pnand %p1518_p6, %p1517_p5  ;;  %p1525_p3 = scmp.lt.u32.totalorder %s1516_s3, %s1932_s5 }
  0x8a   : > { %p1524_p1 = por %p1523_p2, %p1522_p12 }
  0x8b   : > { %p1520_p10 = pneg %p1519_p8 }
  0x8c   : > { %p1526_p7 = por %p1525_p3, %p1524_p1 }
  0x8e   : > { %p1527_p9 = pnand %p1526_p7, %p1520_p10 }
  0x90   : > { %1530 = shalt.err (!%p1527_p9)
}
  0x91   : > { %s1531_s7 = scalar_lea.vmem %s1934_s22, 512  ;;  %s1685_s12 = smov [#allocation3]  }
  0x92   : > { %p1532_p13 = scmp.ne.s32.totalorder %s1934_s22, %s1531_s7  ;;  %s1536_s27 = sshll.u32 %s1685_s12, 4  ;;  %s1537_s27 = int_to_ptr.vmem [resolvable:$false] %s1536_s27 }
  0x93   : > { %s1538_s18 = scalar_lea.vmem %s1537_s27, 1024  ;;  %p1539_p5 = scmp.lt.s32.totalorder %s1934_s22, %s1537_s27 }
  0x94   : > { %p1534_p11 = pnand %p1532_p13, %p1518_p6  ;;  %p1540_p8 = scmp.lt.s32.totalorder %s1538_s18, %s1531_s7 }
  0x96   : > { %p1535_p0 = pneg %p1534_p11  ;;  %p1541_p12 = por %p1540_p8, %p1539_p5 }
  0x98   : > { %p1542_p2 = pnand %p1541_p12, %p1535_p0 }
  0x9a   : > { %1545 = shalt.err (!%p1542_p2)
}
  0x9b   : > { %1290 = dma.hbm_to_vmem [thread:$0]  (!%p1940_p4), %s1932_s5, 512, %s1934_s22, %s1944_s8, %s2347_s6, %s2347_s6, %s2346_s24  }
  0x9c   : > { %p2353_p6 = scmp.ne.s32.totalorder %s2340_s19, 0 }
  0x9d   : > { %s308_s3 = sand.u32 (!%p2353_p6), 1, %s1652_s28   ;;  %p2354_p10 = scmp.ne.s32.totalorder (!%p2353_p6), %s2335_s16, 0 }
  0x9e   : > { %306 = sbr.rel (%p2353_p6) target bundleno = 754 (0x2f2), region = 48  ;;  %s1146_s20 = sshll.u32 (!%p2353_p6), %s308_s3, 5 }
  0x9f   : > { %s309_s15 = scalar_lea.sflag (!%p2353_p6), [#allocation4], %s308_s3  ;;  %s1978_s17 = scalar_lea.vmem (!%p2353_p6), [#allocation3], %s1146_s20 }
  0xa5   : > { %1619 = dma.done.wait (%p2354_p10), %s309_s15, 512  }
  0xa6   : > { %1621 = vsyncadd (%p2354_p10), %s309_s15, 4294966784  ;;  %p2355_p1 = scmp.ne.s32.totalorder %s2334_s14, 0 }
  0xa8   : > { %1623 = dma.done.wait (%p2355_p1), [#allocation7], 1280  }
  0xa9   : > { %1625 = vsyncadd (%p2355_p1), [#allocation7], 4294966016 }
  0xaa   : > { %1627 = dma.done.wait (%p2355_p1), [#allocation10], 1024  }
  0xab   : > { %1629 = vsyncadd (%p2355_p1), [#allocation10], 4294966272  ;;  %s352_s5 = sand.u32 1, %s1640_s25   ;;  %v1686_v0 = vmov 0.0   ;;  %vm1687_vm0 = vmmov 0   ;;  %s1999_s19 = sshll.u32 %s1660_s30, 2 }
  0xac   : > { %s1995_s16 = sshll.u32 %s352_s5, 5  ;;  %1213 = vmatprep.subr.bf16.mxu0 %v1686_v0  ;;  %1229 = vmatprep.mubr.msk.bf16.mxu0 %vm1687_vm0, %v1686_v0  ;;  %s361_s24 = sadd.s32 4, %s1999_s19  ;;  %v1404_v1 = vld [vmem:[#allocation6] sm:$0xff]   ;;  %v1405_v2 = vld [vmem:[#allocation6 + $0x8] sm:$0xff]   ;;  %v1406_v3 = vld [vmem:[#allocation6 + $0x10] sm:$0xff]   ;;  %vm400_vm1 = vcmask 1043456  }
  0xad   : > { %s1155_s14 = sshll.u32 %s1660_s30, 5  ;;  %p362_p4 = scmp.lt.s32.totalorder %s361_s24, 7  ;;  %1214 = vmatpush3.bf16.msra.mxu0 %v1404_v1  ;;  %v1407_v4 = vld [vmem:[#allocation6 + $0x18] sm:$0xff]   ;;  %v1408_v5 = vld [vmem:[#allocation6 + $0x20] sm:$0xff]   ;;  %v1409_v6 = vld [vmem:[#allocation6 + $0x28] sm:$0xff]  }
  0xae   : > { %s371_s6 = sshra.s32 %s1155_s14, 3  ;;  %s1152_s22 = sadd.s32 4294967295, %s1999_s19  ;;  %1215 = vmatprep.subr.bf16.mxu0 %v1686_v0  ;;  %v1410_v7 = vld [vmem:[#allocation6 + $0x30] sm:$0xff]   ;;  %v1411_v8 = vld [vmem:[#allocation6 + $0x38] sm:$0xff]  }
  0xaf   : > { %s2404_s24 = smov (!%p362_p4, %s361_s24), 7  ;;  %s1156_s4 = sshll.u32 %s371_s6, 2  ;;  %v1163_v16 = vld [vmem:[%s2304_s2] ss:$0 sm:$0xff] }
  0xb0   : > { %p359_p3 = scmp.gt.s32.totalorder %s1152_s22, 0  ;;  %s1157_s8 = sshll.u32 %s2404_s24, 3 }
  0xb1   : > { %1216 = vmatpush3.bf16.msra.mxu0 %v1405_v2  ;;  %s380_s13 = sshra.s32 %s1157_s8, 3  ;;  %s2005_s23 = scalar_lea.vmem %s1978_s17, %s1156_s4 [#allocation3] }
  0xb2   : > { %1217 = vmatprep.subr.bf16.mxu0 %v1686_v0  ;;  %s1158_s7 = sshll.u32 %s380_s13, 2  ;;  %s2406_s22 = smov (!%p359_p3, %s1152_s22), 0  ;;  %v1412_v9 = vld [vmem:[%s2005_s23] ss:$0 sps:$4 sm:$0xff]   ;;  %v1413_v12 = vld [vmem:[%s2005_s23 + $0x4] sm:$0xff]  }
  0xb3   : > { %s2008_s12 = scalar_lea.vmem %s1978_s17, %s1158_s7 [#allocation3]  ;;  %s1153_s27 = sshll.u32 %s2406_s22, 3  ;;  %v1414_v13 = vld [vmem:[%s2005_s23 + $0xc] ss:$0 sps:$4 sm:$0xff]  }
  0xb4   : > { %s365_s18 = sshra.s32 %s1153_s27, 3  ;;  %v1415_v14 = vld [vmem:[%s2008_s12] ss:$0 sps:$4 sm:$0xff]   ;;  %s2021_s24 = scalar_lea.vmem [#allocation11], %s1995_s16 }
  0xb5   : > { %1218 = vmatpush3.bf16.msra.mxu0 %v1406_v3  ;;  %s1154_s3 = sshll.u32 %s365_s18, 2  ;;  %v407_v15 = vsel %vm400_vm1, %v1414_v13, %v1415_v14  ;;  %p1172_p7 = scmp.ne.s32.totalorder %s1660_s30, 0 }
  0xb6   : > { %1219 = vmatprep.subr.bf16.mxu0 %v1686_v0  ;;  %s368_s20 = scalar_lea.vmem %s1978_s17, %s1154_s3 [#allocation3]  ;;  %v1688_v41 = vmov (!%p1172_p7), 0.0  }
  0xb7   : > { %v369_v10 = vld [vmem:[%s368_s20] sm:$0xf] }
  0xb8   : > { %v403_v11 = vsel %vm400_vm1, %v369_v10, %v1412_v9 }
  0xb9   : > { %1220 = vmatpush3.bf16.msra.mxu0 %v1407_v4 }
  0xba   : > { %1221 = vmatprep.subr.bf16.mxu0 %v1686_v0 }
  0xbd   : > { %1222 = vmatpush3.bf16.msra.mxu0 %v1408_v5 }
  0xbe   : > { %1223 = vmatprep.subr.bf16.mxu0 %v1686_v0 }
  0xc1   : > { %1224 = vmatpush3.bf16.msra.mxu0 %v1409_v6 }
  0xc2   : > { %1225 = vmatprep.subr.bf16.mxu0 %v1686_v0 }
  0xc5   : > { %1226 = vmatpush3.bf16.msra.mxu0 %v1410_v7 }
  0xc6   : > { %1227 = vmatprep.subr.bf16.mxu0 %v1686_v0 }
  0xc9   : > { %1228 = vmatpush3.bf16.msra.mxu0 %v1411_v8 }
  0xcc   : > { %1230 = vmatmul.mubr.bf16.vlgmr.msra.gmra.mrb[0].mxu0 %v403_v11 }
  0xcd   : > { %1233 = vmatprep.mubr.msk.bf16.mxu0 %vm1687_vm0, %v1686_v0 }
  0xd4   : > { %1234 = vmatmul.mubr.bf16.gmra.mrb[4].mxu0 %v1413_v12 }
  0xd5   : > { %1237 = vmatprep.mubr.msk.bf16.mxu0 %vm1687_vm0, %v1686_v0 }
  0xdc   : > { %1238 = vmatmul.mubr.bf16.gmra.mrb[8].mxu0 %v407_v15 }
 0x19f   : > { %v514_v17 = vpop.f32.mrb[0].mxu0 }
 0x1a0   : > { %v515_v18 = vadd.f32 %v1163_v16, %v514_v17  ;;  %v1231_v19 = vpop.f32.mrb[1].mxu0 }
 0x1a1   : > { %v517_v20 = vpop.f32.mrb[2].mxu0 }
 0x1a2   : > { %v537_v21 = vmax.f32 %v515_v18, 0.0  ;;  %v518_v22 = vadd.f32 %v1163_v16, %v517_v20  ;;  %v1232_v23 = vpop.f32.mrb[3].mxu0 }
 0x1a4   : > { %543 = vst [vmem:[#allocation2] sm:$0xff] %v537_v21  ;;  %v538_v24 = vmax.f32 %v518_v22, 0.0 }
 0x1a5   : > { %553 = vst [vmem:[#allocation2] sm:$0xff] (!%p1172_p7), %v1688_v41 }
 0x1a6   : > { %544 = vst [vmem:[#allocation2 + $0x8] sm:$0xff] %v538_v24 }
 0x1a7   : > { %v522_v25 = vpop.f32.mrb[4].mxu0 }
 0x1a8   : > { %v523_v26 = vadd.f32 %v1163_v16, %v522_v25  ;;  %v1235_v27 = vpop.f32.mrb[5].mxu0 }
 0x1a9   : > { %v525_v28 = vpop.f32.mrb[6].mxu0 }
 0x1aa   : > { %v539_v29 = vmax.f32 %v523_v26, 0.0  ;;  %v526_v30 = vadd.f32 %v1163_v16, %v525_v28  ;;  %v1236_v31 = vpop.f32.mrb[7].mxu0 }
 0x1ac   : > { %545 = vst [vmem:[#allocation2 + $0x10] sm:$0xff] %v539_v29  ;;  %v540_v32 = vmax.f32 %v526_v30, 0.0 }
 0x1ae   : > { %546 = vst [vmem:[#allocation2 + $0x18] sm:$0xff] %v540_v32 }
 0x1af   : > { %v530_v33 = vpop.f32.mrb[8].mxu0 }
 0x1b0   : > { %v531_v34 = vadd.f32 %v1163_v16, %v530_v33  ;;  %v1239_v35 = vpop.f32.mrb[9].mxu0  ;;  %552 = sbr.rel (%p1172_p7) target bundleno = 439 (0x1b7), region = 68 }
 0x1b1   : > { %v533_v36 = vpop.f32.mrb[10].mxu0 }
 0x1b2   : > { %v541_v37 = vmax.f32 %v531_v34, 0.0  ;;  %v534_v38 = vadd.f32 %v1163_v16, %v533_v36  ;;  %v1240_v39 = vpop.f32.mrb[11].mxu0 }
 0x1b4   : > { %547 = vst [vmem:[#allocation2 + $0x20] sm:$0xff] %v541_v37  ;;  %v542_v40 = vmax.f32 %v534_v38, 0.0 }
 0x1b6   : > { %548 = vst [vmem:[#allocation2 + $0x28] sm:$0xff] %v542_v40 }
 0x1b7 PF: > { %p1173_p9 = scmp.ne.s32.totalorder %s1660_s30, 1 }
 0x1b8   : > { %v1689_v42 = vmov (!%p1173_p9), 0.0  }
 0x1b9   : > { %557 = sbr.rel (%p1173_p9) target bundleno = 448 (0x1c0), region = 72  ;;  %558 = vst [vmem:[#allocation2 + $0x28] sm:$0xff] (!%p1173_p9), %v1689_v42 }
 0x1c0 PF: > { %v1416_v43 = vld [vmem:[#allocation9] sm:$0xff]   ;;  %v565_v44 = vlaneseq  ;;  %v1417_v45 = vld [vmem:[#allocation9 + $0x8] sm:$0xff]   ;;  %v1418_v47 = vld [vmem:[#allocation9 + $0x10] sm:$0xff]   ;;  %s2372_s14 = sld [smem:[#allocation24_spill]]  ;;  %s2377_s6 = sld [smem:[#allocation17_spill]] }
 0x1c1   : > { %1241 = vmatprep.subr.bf16.mxu1 %v1416_v43  ;;  %v1419_v51 = vld [vmem:[#allocation9 + $0x18] sm:$0xff]   ;;  %v2031_v53 = vld [vmem:[#allocation2] sm:$0xff]  ;;  %v2033_v54 = vld [vmem:[#allocation2 + $0x8] sm:$0xff]  ;;  %s2378_s23 = sld [smem:[#allocation26_spill]]  ;;  %s1013_s12 = sshll.u32 %s2021_s24, 4  ;;  %s2234_s12 = int_to_ptr.vmem [resolvable:$true] %s1013_s12 }
 0x1c2   : > { %v2025_v46 = vshrl.u32 %v565_v44, 7  ;;  %1242 = vmatpush3.bf16.msra.mxu1 %v1416_v43  ;;  %v2035_v55 = vld [vmem:[#allocation2 + $0x10] sm:$0xff]  ;;  %v2037_v59 = vld [vmem:[#allocation2 + $0x18] sm:$0xff]  ;;  %v2039_v60 = vld [vmem:[#allocation2 + $0x28] sm:$0xff]  ;;  %v650_v61 = vrot.slane %v2031_v53, 7  ;;  %v651_v62 = vrot.slane %v2033_v54, 7 }
 0x1c3   : > { %1243 = vmatprep.subr.bf16.mxu1 %v1417_v45  ;;  %v652_v2 = vrot.slane %v2035_v55, 7  ;;  %v653_v4 = vrot.slane %v2037_v59, 7  ;;  %v655_v5 = vrot.slane %v2039_v60, 7  ;;  %v1420_v6 = vld [vmem:[#allocation9 + $0x20] sm:$0xff]   ;;  %v687_v19 = vrot.slane %v2031_v53, 1  ;;  %v1421_v24 = vld [vmem:[#allocation9 + $0x28] sm:$0xff]  }
 0x1c4   : > { %v567_v48 = vadd.s32 8, %v2025_v46  ;;  %v568_v49 = vadd.s32 16, %v2025_v46  ;;  %v569_v50 = vadd.s32 24, %v2025_v46  ;;  %v576_v52 = vand.u32 7, %v2025_v46  ;;  %v2063_v7 = vld [vmem:[#allocation2 + $0x20] sm:$0xff]  ;;  %v2109_v25 = vld [vmem:[#allocation8] sm:$0xff] }
 0x1c5   : > { %vm656_vm6 = vcmp.lt.s32.totalorder %v2025_v46, 1  ;;  %v688_v20 = vrot.slane %v2033_v54, 1  ;;  %v689_v21 = vrot.slane %v2035_v55, 1  ;;  %v690_v22 = vrot.slane %v2037_v59, 1  ;;  %v1422_v37 = vld [vmem:[#allocation9 + $0x30] sm:$0xff]   ;;  %v1423_v1 = vld [vmem:[#allocation9 + $0x38] sm:$0xff]  }
 0x1c6   : > { %1244 = vmatpush3.bf16.msra.mxu1 %v1417_v45  ;;  %v583_v56 = vand.u32 7, %v567_v48  ;;  %v590_v57 = vand.u32 7, %v568_v49  ;;  %v597_v58 = vand.u32 7, %v569_v50  ;;  %vm2043_vm2 = vcmp.ge.s32.totalorder %v576_v52, 1  ;;  %v1174_v42 = vld [vmem:[%s2372_s14] ss:$0 sm:$0xff] }
 0x1c7   : > { %1245 = vmatprep.subr.bf16.mxu1 %v1418_v47  ;;  %v660_v8 = vsel %vm656_vm6, %v651_v62, %v652_v2  ;;  %v661_v9 = vsel %vm656_vm6, %v650_v61, %v651_v62  ;;  %vm2069_vm7 = vcmp.le.s32.totalorder %v576_v52, 6  ;;  %v659_v12 = vsel %vm656_vm6, %v652_v2, %v653_v4  ;;  %s1187_s22 = sshll.u32 %s2377_s6, 3  ;;  %s2379_s27 = sld [smem:[#allocation18_spill]] }
 0x1c8   : > { %vm2047_vm3 = vcmp.ge.s32.totalorder %v583_v56, 1  ;;  %vm2051_vm4 = vcmp.ge.s32.totalorder %v590_v57, 1  ;;  %vm2056_vm5 = vcmp.ge.s32.totalorder %v597_v58, 1  ;;  %vm2073_vm8 = vcmp.le.s32.totalorder %v583_v56, 6  ;;  %s1010_s4 = sadd.s32 %s1187_s22, %s1999_s19  ;;  %s2380_s3 = sld [smem:[#allocation27_spill]] }
 0x1c9   : > { %v662_v13 = vsel %vm656_vm6, %v655_v5, %v650_v61  ;;  %v2087_v14 = vsel %vm2047_vm3, %v661_v9, 0.0  ;;  %vm2089_vm9 = vcmp.le.s32.totalorder %v590_v57, 6  ;;  %v2097_v17 = vsel %vm2051_vm4, %v660_v8, 0.0  ;;  %s1188_s7 = sshll.u32 %s1010_s4, 7  ;;  %s2241_s15 = scalar_lea.sflag [#allocation5], %s352_s5 }
 0x1ca   : > { %1246 = vmatpush3.bf16.msra.mxu1 %v1418_v47  ;;  %v675_v16 = vsel %vm2043_vm2, %v662_v13, 0.0  ;;  %vm2099_vm10 = vcmp.le.s32.totalorder %v597_v58, 6  ;;  %v691_v23 = vrot.slane %v2063_v7, 1  ;;  %vm693_vm11 = vcmp.lt.s32.totalorder %v2025_v46, 7  ;;  %s1546_s17 = scalar_lea.vmem %s2234_s12, 512  ;;  %s1690_s30 = smov [#allocation11]  }
 0x1cb   : > { %1247 = vmatprep.subr.bf16.mxu1 %v1419_v51  ;;  %v729_v26 = vsub.s32 0, %v2025_v46  ;;  %v741_v27 = vsub.s32 1, %v2025_v46  ;;  %v753_v28 = vsub.s32 2, %v2025_v46  ;;  %v696_v30 = vsel %vm693_vm11, %v689_v21, %v690_v22  ;;  %p1547_p13 = scmp.ne.s32.totalorder %s2234_s12, %s1546_s17  ;;  %s1550_s16 = sshll.u32 %s1690_s30, 4  ;;  %s1551_s16 = int_to_ptr.vmem [resolvable:$false] %s1550_s16 }
 0x1cc   : > { %v695_v29 = vsel %vm693_vm11, %v690_v22, %v691_v23  ;;  %v697_v31 = vsel %vm693_vm11, %v688_v20, %v689_v21  ;;  %v698_v32 = vsel %vm693_vm11, %v687_v19, %v688_v20  ;;  %v2128_v33 = vsel %vm2056_vm5, %v659_v12, 0.0  ;;  %s1552_s14 = scalar_lea.vmem %s1551_s16, 1024  ;;  %p1553_p8 = scmp.lt.s32.totalorder %s2234_s12, %s1551_s16 }
 0x1cd   : > { %v712_v34 = vsel %vm2069_vm7, %v698_v32, 0.0  ;;  %v713_v35 = vsel %vm2073_vm8, %v697_v31, 0.0  ;;  %v2136_v36 = vsel %vm2089_vm9, %v696_v30, 0.0  ;;  %v2140_v38 = vsel %vm2099_vm10, %v695_v29, 0.0  ;;  %p2381_p11 = scmp.ne.s32.totalorder %s2379_s27, 0  ;;  %p1554_p12 = scmp.lt.s32.totalorder %s1552_s14, %s1546_s17 }
 0x1ce   : > { %1248 = vmatpush3.bf16.msra.mxu1 %v1419_v51  ;;  %v730_v39 = vrot.slane %v2109_v25, %v729_v26  ;;  %v742_v40 = vrot.slane %v2109_v25, %v741_v27  ;;  %v754_v41 = vrot.slane %v2109_v25, %v753_v28  ;;  %v765_v43 = vsub.s32 3, %v2025_v46  ;;  %s2232_s20 = scalar_lea.hbm %s2380_s3, %s1188_s7 }
 0x1cf   : > { %1249 = vmatprep.subr.bf16.mxu1 %v1420_v6  ;;  %v777_v44 = vsub.s32 4, %v2025_v46  ;;  %v789_v45 = vsub.s32 5, %v2025_v46  ;;  %v801_v47 = vsub.s32 6, %v2025_v46  ;;  %v813_v8 = vsub.s32 7, %v2025_v46  ;;  %p1548_p0 = pnand %p1547_p13, %p2381_p11  ;;  %p1555_p2 = por %p1554_p12, %p1553_p8 }
 0x1d0   : > { %v731_v48 = vmul.f32 %v730_v39, %v675_v16  ;;  %v732_v49 = vmul.f32 %v730_v39, %v2087_v14  ;;  %v733_v50 = vmul.f32 %v730_v39, %v2097_v17  ;;  %v734_v51 = vmul.f32 %v730_v39, %v2128_v33 }
 0x1d1   : > { %v743_v52 = vmul.f32 %v742_v40, %v2031_v53  ;;  %v744_v56 = vmul.f32 %v742_v40, %v2033_v54  ;;  %v745_v57 = vmul.f32 %v742_v40, %v2035_v55  ;;  %v746_v58 = vmul.f32 %v742_v40, %v2037_v59  ;;  %p1549_p5 = pneg %p1548_p0 }
 0x1d2   : > { %1250 = vmatpush3.bf16.msra.mxu1 %v1420_v6  ;;  %v735_v61 = vadd.f32 %v1174_v42, %v731_v48  ;;  %v736_v62 = vadd.f32 %v1174_v42, %v732_v49  ;;  %v737_v63 = vadd.f32 %v1174_v42, %v733_v50  ;;  %v738_v0 = vadd.f32 %v1174_v42, %v734_v51 }
 0x1d3   : > { %1251 = vmatprep.subr.bf16.mxu1 %v1421_v24  ;;  %v755_v2 = vmul.f32 %v754_v41, %v712_v34  ;;  %v756_v3 = vmul.f32 %v754_v41, %v713_v35  ;;  %v757_v6 = vmul.f32 %v754_v41, %v2136_v36  ;;  %v758_v12 = vmul.f32 %v754_v41, %v2140_v38  ;;  %v2172_v34 = vld [vmem:[#allocation8 + $0x8] ss:$0 sm:$0xff]  ;;  %p1556_p6 = pnand %p1555_p2, %p1549_p5 }
 0x1d4   : > { %v747_v9 = vadd.f32 %v743_v52, %v735_v61  ;;  %v748_v10 = vadd.f32 %v744_v56, %v736_v62  ;;  %v749_v11 = vadd.f32 %v745_v57, %v737_v63  ;;  %v750_v13 = vadd.f32 %v746_v58, %v738_v0 }
 0x1d5   : > { %v766_v15 = vrot.slane %v2109_v25, %v765_v43  ;;  %v778_v16 = vrot.slane %v2109_v25, %v777_v44  ;;  %v790_v18 = vrot.slane %v2109_v25, %v789_v45  ;;  %v827_v49 = vmul.f32 %v2172_v34, %v2136_v36 }
 0x1d6   : > { %1252 = vmatpush3.bf16.msra.mxu1 %v1421_v24  ;;  %v759_v20 = vadd.f32 %v755_v2, %v747_v9  ;;  %v760_v21 = vadd.f32 %v756_v3, %v748_v10  ;;  %v761_v22 = vadd.f32 %v757_v6, %v749_v11  ;;  %v802_v24 = vrot.slane %v2109_v25, %v801_v47 }
 0x1d7   : > { %1253 = vmatprep.subr.bf16.mxu1 %v1422_v37  ;;  %v767_v26 = vmul.f32 %v766_v15, %v2087_v14  ;;  %v768_v27 = vmul.f32 %v766_v15, %v2097_v17  ;;  %v769_v28 = vmul.f32 %v766_v15, %v2128_v33  ;;  %v779_v29 = vmul.f32 %v778_v16, %v2033_v54 }
 0x1d8   : > { %v780_v30 = vmul.f32 %v778_v16, %v2035_v55  ;;  %v781_v31 = vmul.f32 %v778_v16, %v2037_v59  ;;  %v791_v32 = vmul.f32 %v790_v18, %v713_v35  ;;  %v792_v41 = vmul.f32 %v790_v18, %v2136_v36 }
 0x1d9   : > { %v772_v39 = vadd.f32 %v768_v27, %v760_v21  ;;  %v773_v40 = vadd.f32 %v769_v28, %v761_v22  ;;  %v762_v14 = vadd.f32 %v758_v12, %v750_v13  ;;  %v793_v42 = vmul.f32 %v790_v18, %v2140_v38 }
 0x1da   : > { %1254 = vmatpush3.bf16.msra.mxu1 %v1422_v37  ;;  %v771_v37 = vadd.f32 %v767_v26, %v759_v20  ;;  %v803_v43 = vmul.f32 %v802_v24, %v2097_v17  ;;  %v814_v54 = vrot.slane %v2109_v25, %v813_v8  ;;  %v804_v35 = vmul.f32 %v802_v24, %v2128_v33 }
 0x1db   : > { %1255 = vmatprep.subr.bf16.mxu1 %v1423_v1  ;;  %v784_v45 = vadd.f32 %v780_v30, %v772_v39  ;;  %v785_v47 = vadd.f32 %v781_v31, %v773_v40  ;;  %v570_v50 = vadd.s32 32, %v2025_v46  ;;  %v571_v51 = vadd.s32 40, %v2025_v46 }
 0x1dc   : > { %v783_v44 = vadd.f32 %v779_v29, %v771_v37  ;;  %v815_v48 = vmul.f32 %v814_v54, %v2035_v55  ;;  %v816_v17 = vmul.f32 %v814_v54, %v2037_v59  ;;  %v654_v25 = vrot.slane %v2063_v7, 7 }
 0x1dd   : > { %v796_v56 = vadd.f32 %v792_v41, %v784_v45  ;;  %v828_v57 = vmul.f32 %v2172_v34, %v2140_v38  ;;  %v604_v58 = vand.u32 7, %v570_v50  ;;  %v611_v33 = vand.u32 7, %v571_v51 }
 0x1de   : > { %1256 = vmatpush3.bf16.msra.mxu1 %v1423_v1  ;;  %v795_v52 = vadd.f32 %v791_v32, %v783_v44  ;;  %v692_v55 = vrot.slane %v2039_v60, 1  ;;  %v797_v61 = vadd.f32 %v793_v42, %v785_v47  ;;  %v658_v63 = vsel %vm656_vm6, %v653_v4, %v654_v25 }
 0x1df   : > { %v808_v36 = vadd.f32 %v804_v35, %v796_v56  ;;  %vm648_vm12 = vcmp.ge.s32.totalorder %v604_v58, 1  ;;  %vm2193_vm13 = vcmp.ge.s32.totalorder %v611_v33, 1  ;;  %v657_v38 = vsel %vm656_vm6, %v654_v25, %v655_v5 }
 0x1e0   : > { %v807_v62 = vadd.f32 %v803_v43, %v795_v52  ;;  %vm685_vm14 = vcmp.le.s32.totalorder %v604_v58, 6  ;;  %v679_v3 = vsel %vm648_vm12, %v658_v63, 0.0  ;;  %v782_v6 = vmul.f32 %v778_v16, %v2063_v7 }
 0x1e1   : > { %v820_v2 = vadd.f32 %v816_v17, %v808_v36  ;;  %vm2202_vm15 = vcmp.le.s32.totalorder %v611_v33, 6  ;;  %v694_v4 = vsel %vm693_vm11, %v691_v23, %v692_v55  ;;  %v770_v8 = vmul.f32 %v766_v15, %v679_v3 }
 0x1e2   : > { %v819_v1 = vadd.f32 %v815_v48, %v807_v62  ;;  %v805_v9 = vmul.f32 %v802_v24, %v679_v3  ;;  %v680_v5 = vsel %vm2193_vm13, %v657_v38, 0.0  ;;  %v716_v12 = vsel %vm685_vm14, %v694_v4, 0.0 }
 0x1e3   : > { %v832_v11 = vadd.f32 %v828_v57, %v820_v2  ;;  %v699_v13 = vsel %vm693_vm11, %v692_v55, %v687_v19  ;;  %v774_v16 = vadd.f32 %v770_v8, %v762_v14  ;;  %v794_v20 = vmul.f32 %v790_v18, %v716_v12 }
 0x1e4   : > { %v831_v10 = vadd.f32 %v827_v49, %v819_v1  ;;  %v809_v21 = vadd.f32 %v805_v9, %v797_v61  ;;  %v806_v23 = vmul.f32 %v802_v24, %v680_v5  ;;  %v817_v15 = vmul.f32 %v814_v54, %v2063_v7 }
 0x1e5   : > { %v836_v26 = vmul.f32 %v832_v11, %v832_v11  ;;  %v786_v27 = vadd.f32 %v782_v6, %v774_v16  ;;  %v829_v28 = vmul.f32 %v2172_v34, %v716_v12  ;;  %v717_v31 = vsel %vm2202_vm15, %v699_v13, 0.0  ;;  %v1176_v6 = vld [vmem:[%s2378_s23] ss:$0 sm:$0xff] }
 0x1e6   : > { %v835_v22 = vmul.f32 %v831_v10, %v831_v10  ;;  %v818_v46 = vmul.f32 %v814_v54, %v2039_v60  ;;  %v821_v19 = vadd.f32 %v817_v15, %v809_v21  ;;  %v830_v39 = vmul.f32 %v2172_v34, %v717_v31 }
 0x1e7   : > { %v840_v30 = vmul.f32 %v836_v26, %v832_v11  ;;  %v798_v53 = vadd.f32 %v794_v20, %v786_v27  ;;  %v851_v34 = vmul.f32 0.5, %v831_v10  ;;  %v852_v56 = vmul.f32 0.5, %v832_v11 }
 0x1e8   : > { %v839_v29 = vmul.f32 %v835_v22, %v831_v10  ;;  %v833_v40 = vadd.f32 %v829_v28, %v821_v19 }
 0x1e9   : > { %v844_v18 = vmul.f32 0.044715, %v840_v30  ;;  %v810_v37 = vadd.f32 %v806_v23, %v798_v53 }
 0x1ea   : > { %v843_v32 = vmul.f32 0.044715, %v839_v29  ;;  %v837_v14 = vmul.f32 %v833_v40, %v833_v40  ;;  %v853_v62 = vmul.f32 0.5, %v833_v40 }
 0x1eb   : > { %v848_v41 = vadd.f32 %v844_v18, %v832_v11  ;;  %v822_v7 = vadd.f32 %v818_v46, %v810_v37 }
 0x1ec   : > { %v847_v24 = vadd.f32 %v843_v32, %v831_v10  ;;  %v841_v45 = vmul.f32 %v837_v14, %v833_v40 }
 0x1ed   : > { %v856_v43 = vmul.f32 0.7978846, %v848_v41  ;;  %v834_v44 = vadd.f32 %v830_v39, %v822_v7 }
 0x1ee   : > { %v855_v42 = vmul.f32 0.7978846, %v847_v24  ;;  %v845_v35 = vmul.f32 0.044715, %v841_v45 }
 0x1ef   : > { %v838_v47 = vmul.f32 %v834_v44, %v834_v44  ;;  %v854_v63 = vmul.f32 0.5, %v834_v44 }
 0x1f0   : > { %1424 = vtanh.f32 %v855_v42  ;;  %v849_v54 = vadd.f32 %v845_v35, %v833_v40 }
 0x1f1   : > { %1426 = vtanh.f32 %v856_v43  ;;  %v842_v60 = vmul.f32 %v838_v47, %v834_v44 }
 0x1f2   : > { %v857_v49 = vmul.f32 0.7978846, %v849_v54 }
 0x1f3   : > { %v846_v48 = vmul.f32 0.044715, %v842_v60 }
 0x1f4   : > { %1428 = vtanh.f32 %v857_v49 }
 0x1f5   : > { %v850_v50 = vadd.f32 %v846_v48, %v834_v44 }
 0x1f7   : > { %v858_v51 = vmul.f32 0.7978846, %v850_v50 }
 0x1f9   : > { %1430 = vtanh.f32 %v858_v51 }
 0x1fa   : > { %v1425_v52 = vpop.eup %1424 }
 0x1fb   : > { %v1427_v17 = vpop.eup %1426  ;;  %v863_v25 = vadd.f32 1.0, %v1425_v52 }
 0x1fc   : > { %v864_v57 = vadd.f32 1.0, %v1427_v17 }
 0x1fd   : > { %v867_v58 = vmul.f32 %v863_v25, %v851_v34 }
 0x1fe   : > { %v868_v33 = vmul.f32 %v864_v57, %v852_v56  ;;  %v1429_v61 = vpop.eup %1428 }
 0x1ff   : > { %v865_v36 = vadd.f32 1.0, %v1429_v61 }
 0x200   : > { %v871_v55 = vpack.c.bf16 %v868_v33, %v867_v58 }
 0x201   : > { %v869_v1 = vmul.f32 %v865_v36, %v853_v62 }
 0x202   : > { %1257 = vmatprep.mubr.bf16.mxu1 %v871_v55 }
 0x203   : > { %v1431_v0 = vpop.eup %1430 }
 0x204   : > { %v866_v38 = vadd.f32 1.0, %v1431_v0 }
 0x206   : > { %v870_v2 = vmul.f32 %v866_v38, %v854_v63 }
 0x208   : > { %v872_v3 = vpack.c.bf16 %v870_v2, %v869_v1 }
 0x20a   : > { %1258 = vmatmul.mubr.bf16.vlgmr.msra.gmra.mrb[0].mxu1 %v872_v3 }
 0x2dd   : > { %v1259_v59 = vpop.f32.mrb[0].mxu1 }
 0x2de   : > { %v987_v4 = vadd.f32 %v1259_v59, %v1176_v6  ;;  %v978_v8 = vpop.f32.mrb[1].mxu1 }
 0x2df   : > { %v979_v9 = vadd.f32 %v1176_v6, %v978_v8  ;;  %v1260_v10 = vpop.f32.mrb[2].mxu1 }
 0x2e0   : > { %995 = vst [vmem:[%s2021_s24 + $0x10] sm:$0xff] %v987_v4  ;;  %v990_v11 = vadd.f32 %v1260_v10, %v1176_v6  ;;  %v981_v5 = vpop.f32.mrb[3].mxu1 }
 0x2e1   : > { %993 = vst [vmem:[%s2021_s24] sm:$0xff] %v979_v9  ;;  %v982_v12 = vadd.f32 %v1176_v6, %v981_v5 }
 0x2e2   : > { %996 = vst [vmem:[%s2021_s24 + $0x18] sm:$0xff] %v990_v11 }
 0x2e3   : > { %994 = vst [vmem:[%s2021_s24 + $0x8] sm:$0xff] %v982_v12 }
 0x2e4   : > { %1559 = shalt.err (!%p1556_p6)
}
 0x2e5   : > { %s1560_s5 = scalar_lea.hbm %s2232_s20, 512  ;;  %s1564_s22 = scalar_lea.hbm %s2380_s3, 2048 }
 0x2e6   : > { %p1561_p10 = scmp.ne.s32.totalorder %s2232_s20, %s1560_s5  ;;  %p1565_p3 = scmp.lt.u32.totalorder %s2232_s20, %s2380_s3 }
 0x2e7   : > { %p1566_p7 = scmp.lt.u32.totalorder %s1564_s22, %s1560_s5  ;;  %p1568_p13 = scmp.lt.u32.totalorder %s1560_s5, %s2232_s20 }
 0x2e8   : > { %p1562_p1 = pnand %p1561_p10, %p2381_p11 }
 0x2e9   : > { %p1567_p9 = por %p1566_p7, %p1565_p3 }
 0x2ea   : > { %p1563_p4 = pneg %p1562_p1 }
 0x2eb   : > { %p1569_p0 = por %p1568_p13, %p1567_p9 }
 0x2ed   : > { %p1570_p5 = pnand %p1569_p0, %p1563_p4 }
 0x2ef   : > { %1573 = shalt.err (!%p1570_p5)
}
 0x2f0   : > { %s1691_s13 = smov 128   ;;  %s1692_s23 = smov 8  }
 0x2f1   : > { %1275 = dma.vmem_to_hbm [thread:$0]  (%p2381_p11), %s2234_s12, 512, %s2232_s20, %s2241_s15, %s1691_s13, %s1691_s13, %s1692_s23  }
 0x2f2 PF: > { %s2382_s7 = sld [smem:[#allocation16_spill]]  ;;  %s2383_s18 = sld [smem:[#allocation19_spill]] }
 0x2f3   : > { %p1302_p8 = scmp.ge.s32.totalorder %s1676_s11, 2 }
 0x2f8   : > { %s1028_s19 = sand.u32 1, %s2382_s7   ;;  %p2384_p12 = scmp.ne.s32.totalorder %s2383_s18, 0 }
 0x2f9   : > { %s1029_s17 = scalar_lea.sflag [#allocation5], %s1028_s19 }
 0x2fa   : > { %p1292_p2 = pnand %p1302_p8, %p2384_p12 }
 0x2fc   : > { %1631 = dma.done.wait (!%p1292_p2), %s1029_s17, 512  }
 0x2fd   : > { %1633 = vsyncadd (!%p1292_p2), %s1029_s17, 4294966784  ;;  %s25_s11 = sadd.s32 1, %s1676_s11   ;;  %s2385_s12 = sld [smem:[#allocation20_spill]] }
 0x2fe   : > { %p22_p6 = scmp.ge.s32.totalorder %s25_s11, 6   ;;  %s2386_s20 = sld [smem:[#allocation21_spill]] }
 0x2ff   : > { %s2387_s24 = smov %s1640_s25  ;;  %s2388_s25 = smov %s1644_s26 }
 0x300   : > { %s2389_s26 = smov %s1927_s1  ;;  %s2390_s27 = smov %s1652_s28 }
 0x301   : > { %s2391_s28 = smov %s1656_s29  ;;  %s2392_s29 = smov %s1922_s21 }
 0x302   : > { %s2393_s30 = smov %s1668_s9  ;;  %s2394_s8 = smov %s1672_s10 }
 0x303   : > { %s2395_s9 = smov %s2385_s12  ;;  %24 = sbr.rel (!%p22_p6) target bundleno = 18 (0x12), region = 116 }
 0x304   : > { %s2396_s10 = smov %s2386_s20 }
 0x30a   :  { %1034 = vsyncpa [#allocation4], 1 }
 0x30b   :  { %1036 = vsyncpa [#allocation4 + $0x1], 1 }
 0x30c   :  { %1037 = vsyncpa [#allocation7], 1 }
 0x30d   :  { %1038 = vsyncpa [#allocation10], 1 }
 0x30e   :  { %1039 = vsyncpa [#allocation5], 1 }
 0x30f   :  { %1041 = vsyncpa [#allocation5 + $0x1], 1 }

</bundles_post_ra>
